<compile_context>
chip_gen: v7x
topology: tpu7x:2x2x1
jax: 0.10.0
libtpu: 0.0.40
codegen_flags: <defaults>
</compile_context>

<pallas_src>
import jax
import jax.numpy as jnp
from jax.experimental import pallas as pl
from jax.experimental.pallas import tpu as pltpu

BN_EPS = 1e-5        # nn.BatchNorm2d default
NORM_EPS = 1e-12     # F.normalize default
HIDDEN = 128         # fixed by the module (conv7: C -> 128)


# ---------------------------------------------------------------- kernels ----

def _stats1_kernel(x_ref, w7_ref, b7_ref, s_ref, ss_ref):
    # x_ref: (C, tile)   w7_ref: (128, C)   b7_ref: (128, 1)
    h = jnp.dot(w7_ref[...], x_ref[...],
                preferred_element_type=jnp.float32) + b7_ref[...]
    h = jnp.maximum(h, 0.0)                               # (128, tile)
    s_ref[...] = jnp.sum(h, axis=1, keepdims=True)        # (128, 1)
    ss_ref[...] = jnp.sum(h * h, axis=1, keepdims=True)


def _stats2_kernel(x_ref, w7_ref, b7_ref, w8_ref, b8_ref, s_ref, ss_ref):
    # w8_ref/b8_ref already have the bn7 affine folded in.
    h = jnp.maximum(
        jnp.dot(w7_ref[...], x_ref[...],
                preferred_element_type=jnp.float32) + b7_ref[...], 0.0)
    z = jnp.maximum(
        jnp.dot(w8_ref[...], h,
                preferred_element_type=jnp.float32) + b8_ref[...], 0.0)   # (C, tile)
    s_ref[...] = jnp.sum(z, axis=1, keepdims=True)         # (C, 1)
    ss_ref[...] = jnp.sum(z * z, axis=1, keepdims=True)


def _apply_kernel(x_ref, w7_ref, b7_ref, w8_ref, b8_ref, sc8_ref, sh8_ref, o_ref):
    h = jnp.maximum(
        jnp.dot(w7_ref[...], x_ref[...],
                preferred_element_type=jnp.float32) + b7_ref[...], 0.0)
    z = jnp.maximum(
        jnp.dot(w8_ref[...], h,
                preferred_element_type=jnp.float32) + b8_ref[...], 0.0)   # (C, tile)
    zb = z * sc8_ref[...] + sh8_ref[...]                   # bn8 affine
    ssq = jnp.sum(zb * zb, axis=0, keepdims=True)          # (1, tile) per-pixel sumsq
    # F.normalize: x / max(||x||, eps)  ==  x * rsqrt(max(sumsq, eps^2))
    o_ref[...] = (zb * jax.lax.rsqrt(
        jnp.maximum(ssq, NORM_EPS * NORM_EPS))).astype(o_ref.dtype)


# ---------------------------------------------------------------- wrapper ----

def _choose_tile(hw, cap=1024):
    """Largest lane-dense tile (multiple of 128) dividing hw, capped so the
    (128, tile) hidden slab plus double-buffered I/O fits v7x's smaller VMEM."""
    if hw <= cap:
        return hw
    if hw % 128 != 0:
        # TODO(synk): pad H*W to a multiple of 128 for large, unaligned spatial sizes.
        return hw
    t = (cap // 128) * 128
    while t >= 128:
        if hw % t == 0:
            return t
        t -= 128
    return hw


def predictor_forward(x_nchw, params):
    """x_nchw: (N, C, H, W) float32 -> (N, C, H, W) float32 (train-mode BN)."""
    N, C, H, W = x_nchw.shape
    HW = H * W
    M = N * HW
    x3 = x_nchw.reshape(N, C, HW)        # free contiguous reshape, no transpose

    tile = _choose_tile(HW)
    T = HW // tile
    grid = (N, T)
    cparams = pltpu.CompilerParams(
        dimension_semantics=("parallel", "parallel"))

    w7, b7 = params["w7"], params["b7"]          # (128, C), (128, 1)
    g7, beta7 = params["g7"], params["beta7"]    # (128,), (128,)
    w8, b8 = params["w8"], params["b8"]          # (C, 128), (C,)
    g8, beta8 = params["g8"], params["beta8"]    # (C,), (C,)

    x_spec = pl.BlockSpec((None, C, tile), lambda n, t: (n, 0, t))
    out_spec = pl.BlockSpec((None, C, tile), lambda n, t: (n, 0, t))
    w7_spec = pl.BlockSpec((HIDDEN, C), lambda n, t: (0, 0))
    b7_spec = pl.BlockSpec((HIDDEN, 1), lambda n, t: (0, 0))
    w8_spec = pl.BlockSpec((C, HIDDEN), lambda n, t: (0, 0))
    cvec_spec = pl.BlockSpec((C, 1), lambda n, t: (0, 0))
    stat_h_spec = pl.BlockSpec((None, None, HIDDEN, 1), lambda n, t: (n, t, 0, 0))
    stat_c_spec = pl.BlockSpec((None, None, C, 1), lambda n, t: (n, t, 0, 0))

    # ---- pass 1: per-tile partial stats of h = relu(conv7(x)) ----
    sum_h, ssq_h = pl.pallas_call(
        _stats1_kernel,
        out_shape=(jax.ShapeDtypeStruct((N, T, HIDDEN, 1), jnp.float32),
                   jax.ShapeDtypeStruct((N, T, HIDDEN, 1), jnp.float32)),
        grid=grid,
        in_specs=[x_spec, w7_spec, b7_spec],
        out_specs=(stat_h_spec, stat_h_spec),
        compiler_params=cparams,
    )(x3, w7, b7)

    # bn7 batch statistics (biased variance); fold bn7 affine into conv8.
    sh = jnp.sum(sum_h, axis=(0, 1))[:, 0]
    shh = jnp.sum(ssq_h, axis=(0, 1))[:, 0]
    mu7 = sh / M
    var7 = jnp.maximum(shh / M - mu7 * mu7, 0.0)
    inv7 = jax.lax.rsqrt(var7 + BN_EPS)
    scale7 = g7 * inv7
    shift7 = beta7 - mu7 * scale7
    w8_eff = w8 * scale7[None, :]                     # (C, 128)
    b8_eff = (w8 @ shift7 + b8)[:, None]              # (C, 1)

    # ---- pass 2: per-tile partial stats of z = relu(conv8(bn7(h))) ----
    sum_z, ssq_z = pl.pallas_call(
        _stats2_kernel,
        out_shape=(jax.ShapeDtypeStruct((N, T, C, 1), jnp.float32),
                   jax.ShapeDtypeStruct((N, T, C, 1), jnp.float32)),
        grid=grid,
        in_specs=[x_spec, w7_spec, b7_spec, w8_spec, cvec_spec],
        out_specs=(stat_c_spec, stat_c_spec),
        compiler_params=cparams,
    )(x3, w7, b7, w8_eff, b8_eff)

    sz = jnp.sum(sum_z, axis=(0, 1))[:, 0]
    szz = jnp.sum(ssq_z, axis=(0, 1))[:, 0]
    mu8 = sz / M
    var8 = jnp.maximum(szz / M - mu8 * mu8, 0.0)
    inv8 = jax.lax.rsqrt(var8 + BN_EPS)
    scale8 = (g8 * inv8)[:, None]                     # (C, 1)
    shift8 = (beta8 - mu8 * g8 * inv8)[:, None]       # (C, 1)

    # ---- pass 3: apply bn8 + per-pixel L2 normalize, write NCHW output ----
    out3 = pl.pallas_call(
        _apply_kernel,
        out_shape=jax.ShapeDtypeStruct((N, C, HW), jnp.float32),
        grid=grid,
        in_specs=[x_spec, w7_spec, b7_spec, w8_spec, cvec_spec,
                  cvec_spec, cvec_spec],
        out_specs=out_spec,
        compiler_params=cparams,
    )(x3, w7, b7, w8_eff, b8_eff, scale8, shift8)

    return out3.reshape(N, C, H, W)


# ------------------------------------------------------------------ params ----

def init_params(key, n_features_final_layer, hidden=HIDDEN):
    """Mirrors the module's __init__ values:
       conv weights: kaiming_uniform_ (a=0 -> bound = sqrt(6/fan_in), fan_in = in_ch
       for a 1x1 conv), conv bias = 0.01, bn weight = 1 (default), bn bias = 0.001.
       Conv weights are stored in torch orientation with the 1x1 spatial dims squeezed:
       w7 = conv7.weight[:,:,0,0] (128, C);  w8 = conv8.weight[:,:,0,0] (C, 128)."""
    c = n_features_final_layer
    k7, k8 = jax.random.split(key)
    bound7 = (6.0 / c) ** 0.5
    w7 = jax.random.uniform(k7, (hidden, c), jnp.float32, -bound7, bound7)
    b7 = jnp.full((hidden, 1), 0.01, jnp.float32)
    g7 = jnp.ones((hidden,), jnp.float32)
    beta7 = jnp.full((hidden,), 0.001, jnp.float32)
    bound8 = (6.0 / hidden) ** 0.5
    w8 = jax.random.uniform(k8, (c, hidden), jnp.float32, -bound8, bound8)
    b8 = jnp.full((c,), 0.01, jnp.float32)
    g8 = jnp.ones((c,), jnp.float32)
    beta8 = jnp.full((c,), 0.001, jnp.float32)
    return dict(w7=w7, b7=b7, g7=g7, beta7=beta7,
                w8=w8, b8=b8, g8=g8, beta8=beta8)


def _reference_forward(x, params):
    """Plain-JAX reference matching the PyTorch module (train-mode BN)."""
    def bcast(v):
        return v.reshape(1, -1, 1, 1)
    h = jnp.einsum("oc,nchw->nohw", params["w7"], x) + bcast(params["b7"][:, 0])
    h = jnp.maximum(h, 0.0)
    mu = h.mean(axis=(0, 2, 3), keepdims=True)
    var = ((h - mu) ** 2).mean(axis=(0, 2, 3), keepdims=True)
    h = (h - mu) * jax.lax.rsqrt(var + BN_EPS) * bcast(params["g7"]) + bcast(params["beta7"])
    y = jnp.einsum("co,nohw->nchw", params["w8"], h) + bcast(params["b8"])
    y = jnp.maximum(y, 0.0)
    mu8 = y.mean(axis=(0, 2, 3), keepdims=True)
    var8 = ((y - mu8) ** 2).mean(axis=(0, 2, 3), keepdims=True)
    y = (y - mu8) * jax.lax.rsqrt(var8 + BN_EPS) * bcast(params["g8"]) + bcast(params["beta8"])
    norm = jnp.sqrt(jnp.sum(y * y, axis=1, keepdims=True))
    return y / jnp.maximum(norm, NORM_EPS)


if __name__ == "__main__":
    key = jax.random.PRNGKey(0)
    k_x, k_p = jax.random.split(key)

    N, C, H, W = 2, 4, 16, 16           # C = nFeaturesFinalLayer
    x = jax.random.normal(k_x, (N, C, H, W), jnp.float32)
    params = init_params(k_p, C)

    out = jax.jit(predictor_forward)(x, params)
    out = jax.block_until_ready(out)
    assert out.shape == (N, C, H, W)

    ref = _reference_forward(x, params)
    err = float(jnp.max(jnp.abs(out - ref)))
    assert err < 1e-3, f"max abs error vs reference: {err}"

    print("KERNEL_OK")
</pallas_src>

<mosaic_0001>
module attributes {stable_mosaic.version = 11 : i64} {
  func.func @_stats1_kernel(%arg0: i32, %arg1: i32, %arg2: memref<1x4x256xf32, #tpu.memory_space<vmem>>, %arg3: memref<128x4xf32, #tpu.memory_space<vmem>>, %arg4: memref<128x1xf32, #tpu.memory_space<vmem>>, %arg5: memref<1x1x128x1xf32, #tpu.memory_space<vmem>>, %arg6: memref<1x1x128x1xf32, #tpu.memory_space<vmem>>) attributes {dimension_semantics = [#tpu.dimension_semantics<parallel>, #tpu.dimension_semantics<parallel>], iteration_bounds = array<i64: 2, 1>, scalar_prefetch = 0 : i64, scratch_operands = 0 : i64, tpu.core_type = #tpu.core_type<tc>, window_params = [{transform_indices = @transform_0, window_bounds = array<i64: 1, 4, 256>}, {pipeline_mode = #tpu.pipeline_mode<synchronous>, transform_indices = @transform_1, window_bounds = array<i64: 128, 4>}, {pipeline_mode = #tpu.pipeline_mode<synchronous>, transform_indices = @transform_2, window_bounds = array<i64: 128, 1>}, {transform_indices = @transform_3, window_bounds = array<i64: 1, 1, 128, 1>}, {transform_indices = @transform_4, window_bounds = array<i64: 1, 1, 128, 1>}]} {
    %c0 = arith.constant 0 : index
    %c0_0 = arith.constant 0 : index
    %0 = vector.load %arg3[%c0, %c0_0] : memref<128x4xf32, #tpu.memory_space<vmem>>, vector<128x4xf32>
    %c0_1 = arith.constant 0 : index
    %c0_2 = arith.constant 0 : index
    %c0_3 = arith.constant 0 : index
    %1 = vector.load %arg2[%c0_1, %c0_2, %c0_3] : memref<1x4x256xf32, #tpu.memory_space<vmem>>, vector<1x4x256xf32>
    %2 = vector.shape_cast %1 : vector<1x4x256xf32> to vector<4x256xf32>
    %cst = arith.constant dense<0.000000e+00> : vector<128x256xf32>
    %3 = tpu.matmul %0, %2, %cst {dimension_numbers = #tpu.dot_dimension_numbers<[1], [0], [0], [1], [0, 0, 1, 1], [], []>} : vector<128x4xf32>, vector<4x256xf32>, vector<128x256xf32> -> vector<128x256xf32>
    %c0_4 = arith.constant 0 : index
    %c0_5 = arith.constant 0 : index
    %4 = vector.load %arg4[%c0_4, %c0_5] : memref<128x1xf32, #tpu.memory_space<vmem>>, vector<128x1xf32>
    %5 = vector.broadcast %4 : vector<128x1xf32> to vector<128x256xf32>
    %6 = arith.addf %3, %5 : vector<128x256xf32>
    %cst_6 = arith.constant 0.000000e+00 : f32
    %7 = vector.broadcast %cst_6 : f32 to vector<128x256xf32>
    %8 = arith.maximumf %6, %7 : vector<128x256xf32>
    %cst_7 = arith.constant dense<0.000000e+00> : vector<128xf32>
    %9 = vector.multi_reduction <add>, %8, %cst_7 [1] : vector<128x256xf32> to vector<128xf32>
    %10 = vector.shape_cast %9 : vector<128xf32> to vector<128x1xf32>
    %c0_8 = arith.constant 0 : index
    %c0_9 = arith.constant 0 : index
    %c0_10 = arith.constant 0 : index
    %c0_11 = arith.constant 0 : index
    %11 = vector.load %arg5[%c0_8, %c0_9, %c0_10, %c0_11] : memref<1x1x128x1xf32, #tpu.memory_space<vmem>>, vector<1x1x128x1xf32>
    %12 = vector.shape_cast %11 : vector<1x1x128x1xf32> to vector<128x1xf32>
    %13 = vector.shape_cast %10 : vector<128x1xf32> to vector<1x1x128x1xf32>
    tpu.vector_store %arg5[%c0_8, %c0_9, %c0_10, %c0_11], %13 {strides = array<i32>} : memref<1x1x128x1xf32, #tpu.memory_space<vmem>>, vector<1x1x128x1xf32>,
    %14 = arith.mulf %8, %8 : vector<128x256xf32>
    %cst_12 = arith.constant dense<0.000000e+00> : vector<128xf32>
    %15 = vector.multi_reduction <add>, %14, %cst_12 [1] : vector<128x256xf32> to vector<128xf32>
    %16 = vector.shape_cast %15 : vector<128xf32> to vector<128x1xf32>
    %c0_13 = arith.constant 0 : index
    %c0_14 = arith.constant 0 : index
    %c0_15 = arith.constant 0 : index
    %c0_16 = arith.constant 0 : index
    %17 = vector.load %arg6[%c0_13, %c0_14, %c0_15, %c0_16] : memref<1x1x128x1xf32, #tpu.memory_space<vmem>>, vector<1x1x128x1xf32>
    %18 = vector.shape_cast %17 : vector<1x1x128x1xf32> to vector<128x1xf32>
    %19 = vector.shape_cast %16 : vector<128x1xf32> to vector<1x1x128x1xf32>
    tpu.vector_store %arg6[%c0_13, %c0_14, %c0_15, %c0_16], %19 {strides = array<i32>} : memref<1x1x128x1xf32, #tpu.memory_space<vmem>>, vector<1x1x128x1xf32>,
    return
  }
  func.func @transform_0(%arg0: i32, %arg1: i32) -> (i32, i32, i32) {
    %c0_i32 = arith.constant 0 : i32
    %c0_i32_0 = arith.constant 0 : i32
    return %arg0, %c0_i32, %arg1 : i32, i32, i32
  }
  func.func @transform_1(%arg0: i32, %arg1: i32) -> (i32, i32) {
    %c0_i32 = arith.constant 0 : i32
    %c0_i32_0 = arith.constant 0 : i32
    %c0_i32_1 = arith.constant 0 : i32
    return %c0_i32, %c0_i32_0 : i32, i32
  }
  func.func @transform_2(%arg0: i32, %arg1: i32) -> (i32, i32) {
    %c0_i32 = arith.constant 0 : i32
    %c0_i32_0 = arith.constant 0 : i32
    %c0_i32_1 = arith.constant 0 : i32
    return %c0_i32, %c0_i32_0 : i32, i32
  }
  func.func @transform_3(%arg0: i32, %arg1: i32) -> (i32, i32, i32, i32) {
    %c0_i32 = arith.constant 0 : i32
    %c0_i32_0 = arith.constant 0 : i32
    %c0_i32_1 = arith.constant 0 : i32
    return %arg0, %arg1, %c0_i32, %c0_i32_0 : i32, i32, i32, i32
  }
  func.func @transform_4(%arg0: i32, %arg1: i32) -> (i32, i32, i32, i32) {
    %c0_i32 = arith.constant 0 : i32
    %c0_i32_0 = arith.constant 0 : i32
    %c0_i32_1 = arith.constant 0 : i32
    return %arg0, %arg1, %c0_i32, %c0_i32_0 : i32, i32, i32, i32
  }
}

module attributes {stable_mosaic.version = 11 : i64} {
  func.func @_apply_kernel(%arg0: i32, %arg1: i32, %arg2: memref<1x4x256xf32, #tpu.memory_space<vmem>>, %arg3: memref<128x4xf32, #tpu.memory_space<vmem>>, %arg4: memref<128x1xf32, #tpu.memory_space<vmem>>, %arg5: memref<4x128xf32, #tpu.memory_space<vmem>>, %arg6: memref<4x1xf32, #tpu.memory_space<vmem>>, %arg7: memref<4x1xf32, #tpu.memory_space<vmem>>, %arg8: memref<4x1xf32, #tpu.memory_space<vmem>>, %arg9: memref<1x4x256xf32, #tpu.memory_space<vmem>>) attributes {dimension_semantics = [#tpu.dimension_semantics<parallel>, #tpu.dimension_semantics<parallel>], iteration_bounds = array<i64: 2, 1>, scalar_prefetch = 0 : i64, scratch_operands = 0 : i64, tpu.core_type = #tpu.core_type<tc>, window_params = [{transform_indices = @transform_0, window_bounds = array<i64: 1, 4, 256>}, {pipeline_mode = #tpu.pipeline_mode<synchronous>, transform_indices = @transform_1, window_bounds = array<i64: 128, 4>}, {pipeline_mode = #tpu.pipeline_mode<synchronous>, transform_indices = @transform_2, window_bounds = array<i64: 128, 1>}, {pipeline_mode = #tpu.pipeline_mode<synchronous>, transform_indices = @transform_3, window_bounds = array<i64: 4, 128>}, {pipeline_mode = #tpu.pipeline_mode<synchronous>, transform_indices = @transform_4, window_bounds = array<i64: 4, 1>}, {pipeline_mode = #tpu.pipeline_mode<synchronous>, transform_indices = @transform_5, window_bounds = array<i64: 4, 1>}, {pipeline_mode = #tpu.pipeline_mode<synchronous>, transform_indices = @transform_6, window_bounds = array<i64: 4, 1>}, {transform_indices = @transform_7, window_bounds = array<i64: 1, 4, 256>}]} {
    %c0 = arith.constant 0 : index
    %c0_0 = arith.constant 0 : index
    %0 = vector.load %arg3[%c0, %c0_0] : memref<128x4xf32, #tpu.memory_space<vmem>>, vector<128x4xf32>
    %c0_1 = arith.constant 0 : index
    %c0_2 = arith.constant 0 : index
    %c0_3 = arith.constant 0 : index
    %1 = vector.load %arg2[%c0_1, %c0_2, %c0_3] : memref<1x4x256xf32, #tpu.memory_space<vmem>>, vector<1x4x256xf32>
    %2 = vector.shape_cast %1 : vector<1x4x256xf32> to vector<4x256xf32>
    %cst = arith.constant dense<0.000000e+00> : vector<128x256xf32>
    %3 = tpu.matmul %0, %2, %cst {dimension_numbers = #tpu.dot_dimension_numbers<[1], [0], [0], [1], [0, 0, 1, 1], [], []>} : vector<128x4xf32>, vector<4x256xf32>, vector<128x256xf32> -> vector<128x256xf32>
    %c0_4 = arith.constant 0 : index
    %c0_5 = arith.constant 0 : index
    %4 = vector.load %arg4[%c0_4, %c0_5] : memref<128x1xf32, #tpu.memory_space<vmem>>, vector<128x1xf32>
    %5 = vector.broadcast %4 : vector<128x1xf32> to vector<128x256xf32>
    %6 = arith.addf %3, %5 : vector<128x256xf32>
    %cst_6 = arith.constant 0.000000e+00 : f32
    %7 = vector.broadcast %cst_6 : f32 to vector<128x256xf32>
    %8 = arith.maximumf %6, %7 : vector<128x256xf32>
    %c0_7 = arith.constant 0 : index
    %c0_8 = arith.constant 0 : index
    %9 = vector.load %arg5[%c0_7, %c0_8] : memref<4x128xf32, #tpu.memory_space<vmem>>, vector<4x128xf32>
    %cst_9 = arith.constant dense<0.000000e+00> : vector<4x256xf32>
    %10 = tpu.matmul %9, %8, %cst_9 {dimension_numbers = #tpu.dot_dimension_numbers<[1], [0], [0], [1], [0, 0, 1, 1], [], []>} : vector<4x128xf32>, vector<128x256xf32>, vector<4x256xf32> -> vector<4x256xf32>
    %c0_10 = arith.constant 0 : index
    %c0_11 = arith.constant 0 : index
    %11 = vector.load %arg6[%c0_10, %c0_11] : memref<4x1xf32, #tpu.memory_space<vmem>>, vector<4x1xf32>
    %12 = vector.broadcast %11 : vector<4x1xf32> to vector<4x256xf32>
    %13 = arith.addf %10, %12 : vector<4x256xf32>
    %cst_12 = arith.constant 0.000000e+00 : f32
    %14 = vector.broadcast %cst_12 : f32 to vector<4x256xf32>
    %15 = arith.maximumf %13, %14 : vector<4x256xf32>
    %c0_13 = arith.constant 0 : index
    %c0_14 = arith.constant 0 : index
    %16 = vector.load %arg7[%c0_13, %c0_14] : memref<4x1xf32, #tpu.memory_space<vmem>>, vector<4x1xf32>
    %17 = vector.broadcast %16 : vector<4x1xf32> to vector<4x256xf32>
    %18 = arith.mulf %15, %17 : vector<4x256xf32>
    %c0_15 = arith.constant 0 : index
    %c0_16 = arith.constant 0 : index
    %19 = vector.load %arg8[%c0_15, %c0_16] : memref<4x1xf32, #tpu.memory_space<vmem>>, vector<4x1xf32>
    %20 = vector.broadcast %19 : vector<4x1xf32> to vector<4x256xf32>
    %21 = arith.addf %18, %20 : vector<4x256xf32>
    %22 = arith.mulf %21, %21 : vector<4x256xf32>
    %cst_17 = arith.constant dense<0.000000e+00> : vector<256xf32>
    %23 = vector.multi_reduction <add>, %22, %cst_17 [0] : vector<4x256xf32> to vector<256xf32>
    %24 = vector.shape_cast %23 : vector<256xf32> to vector<1x256xf32>
    %cst_18 = arith.constant 1.000000e-24 : f32
    %25 = vector.broadcast %cst_18 : f32 to vector<1x256xf32>
    %26 = arith.maximumf %24, %25 : vector<1x256xf32>
    %27 = math.rsqrt %26 : vector<1x256xf32>
    %28 = vector.broadcast %27 : vector<1x256xf32> to vector<4x256xf32>
    %29 = arith.mulf %21, %28 : vector<4x256xf32>
    %c0_19 = arith.constant 0 : index
    %c0_20 = arith.constant 0 : index
    %c0_21 = arith.constant 0 : index
    %30 = vector.load %arg9[%c0_19, %c0_20, %c0_21] : memref<1x4x256xf32, #tpu.memory_space<vmem>>, vector<1x4x256xf32>
    %31 = vector.shape_cast %30 : vector<1x4x256xf32> to vector<4x256xf32>
    %32 = vector.shape_cast %29 : vector<4x256xf32> to vector<1x4x256xf32>
    tpu.vector_store %arg9[%c0_19, %c0_20, %c0_21], %32 {strides = array<i32>} : memref<1x4x256xf32, #tpu.memory_space<vmem>>, vector<1x4x256xf32>,
    return
  }
  func.func @transform_0(%arg0: i32, %arg1: i32) -> (i32, i32, i32) {
    %c0_i32 = arith.constant 0 : i32
    %c0_i32_0 = arith.constant 0 : i32
    return %arg0, %c0_i32, %arg1 : i32, i32, i32
  }
  func.func @transform_1(%arg0: i32, %arg1: i32) -> (i32, i32) {
    %c0_i32 = arith.constant 0 : i32
    %c0_i32_0 = arith.constant 0 : i32
    %c0_i32_1 = arith.constant 0 : i32
    return %c0_i32, %c0_i32_0 : i32, i32
  }
  func.func @transform_2(%arg0: i32, %arg1: i32) -> (i32, i32) {
    %c0_i32 = arith.constant 0 : i32
    %c0_i32_0 = arith.constant 0 : i32
    %c0_i32_1 = arith.constant 0 : i32
    return %c0_i32, %c0_i32_0 : i32, i32
  }
  func.func @transform_3(%arg0: i32, %arg1: i32) -> (i32, i32) {
    %c0_i32 = arith.constant 0 : i32
    %c0_i32_0 = arith.constant 0 : i32
    %c0_i32_1 = arith.constant 0 : i32
    return %c0_i32, %c0_i32_0 : i32, i32
  }
  func.func @transform_4(%arg0: i32, %arg1: i32) -> (i32, i32) {
    %c0_i32 = arith.constant 0 : i32
    %c0_i32_0 = arith.constant 0 : i32
    %c0_i32_1 = arith.constant 0 : i32
    return %c0_i32, %c0_i32_0 : i32, i32
  }
  func.func @transform_5(%arg0: i32, %arg1: i32) -> (i32, i32) {
    %c0_i32 = arith.constant 0 : i32
    %c0_i32_0 = arith.constant 0 : i32
    %c0_i32_1 = arith.constant 0 : i32
    return %c0_i32, %c0_i32_0 : i32, i32
  }
  func.func @transform_6(%arg0: i32, %arg1: i32) -> (i32, i32) {
    %c0_i32 = arith.constant 0 : i32
    %c0_i32_0 = arith.constant 0 : i32
    %c0_i32_1 = arith.constant 0 : i32
    return %c0_i32, %c0_i32_0 : i32, i32
  }
  func.func @transform_7(%arg0: i32, %arg1: i32) -> (i32, i32, i32) {
    %c0_i32 = arith.constant 0 : i32
    %c0_i32_0 = arith.constant 0 : i32
    return %arg0, %c0_i32, %arg1 : i32, i32, i32
  }
}

module attributes {stable_mosaic.version = 11 : i64} {
  func.func @_stats2_kernel(%arg0: i32, %arg1: i32, %arg2: memref<1x4x256xf32, #tpu.memory_space<vmem>>, %arg3: memref<128x4xf32, #tpu.memory_space<vmem>>, %arg4: memref<128x1xf32, #tpu.memory_space<vmem>>, %arg5: memref<4x128xf32, #tpu.memory_space<vmem>>, %arg6: memref<4x1xf32, #tpu.memory_space<vmem>>, %arg7: memref<1x1x4x1xf32, #tpu.memory_space<vmem>>, %arg8: memref<1x1x4x1xf32, #tpu.memory_space<vmem>>) attributes {dimension_semantics = [#tpu.dimension_semantics<parallel>, #tpu.dimension_semantics<parallel>], iteration_bounds = array<i64: 2, 1>, scalar_prefetch = 0 : i64, scratch_operands = 0 : i64, tpu.core_type = #tpu.core_type<tc>, window_params = [{transform_indices = @transform_0, window_bounds = array<i64: 1, 4, 256>}, {pipeline_mode = #tpu.pipeline_mode<synchronous>, transform_indices = @transform_1, window_bounds = array<i64: 128, 4>}, {pipeline_mode = #tpu.pipeline_mode<synchronous>, transform_indices = @transform_2, window_bounds = array<i64: 128, 1>}, {pipeline_mode = #tpu.pipeline_mode<synchronous>, transform_indices = @transform_3, window_bounds = array<i64: 4, 128>}, {pipeline_mode = #tpu.pipeline_mode<synchronous>, transform_indices = @transform_4, window_bounds = array<i64: 4, 1>}, {transform_indices = @transform_5, window_bounds = array<i64: 1, 1, 4, 1>}, {transform_indices = @transform_6, window_bounds = array<i64: 1, 1, 4, 1>}]} {
    %c0 = arith.constant 0 : index
    %c0_0 = arith.constant 0 : index
    %0 = vector.load %arg3[%c0, %c0_0] : memref<128x4xf32, #tpu.memory_space<vmem>>, vector<128x4xf32>
    %c0_1 = arith.constant 0 : index
    %c0_2 = arith.constant 0 : index
    %c0_3 = arith.constant 0 : index
    %1 = vector.load %arg2[%c0_1, %c0_2, %c0_3] : memref<1x4x256xf32, #tpu.memory_space<vmem>>, vector<1x4x256xf32>
    %2 = vector.shape_cast %1 : vector<1x4x256xf32> to vector<4x256xf32>
    %cst = arith.constant dense<0.000000e+00> : vector<128x256xf32>
    %3 = tpu.matmul %0, %2, %cst {dimension_numbers = #tpu.dot_dimension_numbers<[1], [0], [0], [1], [0, 0, 1, 1], [], []>} : vector<128x4xf32>, vector<4x256xf32>, vector<128x256xf32> -> vector<128x256xf32>
    %c0_4 = arith.constant 0 : index
    %c0_5 = arith.constant 0 : index
    %4 = vector.load %arg4[%c0_4, %c0_5] : memref<128x1xf32, #tpu.memory_space<vmem>>, vector<128x1xf32>
    %5 = vector.broadcast %4 : vector<128x1xf32> to vector<128x256xf32>
    %6 = arith.addf %3, %5 : vector<128x256xf32>
    %cst_6 = arith.constant 0.000000e+00 : f32
    %7 = vector.broadcast %cst_6 : f32 to vector<128x256xf32>
    %8 = arith.maximumf %6, %7 : vector<128x256xf32>
    %c0_7 = arith.constant 0 : index
    %c0_8 = arith.constant 0 : index
    %9 = vector.load %arg5[%c0_7, %c0_8] : memref<4x128xf32, #tpu.memory_space<vmem>>, vector<4x128xf32>
    %cst_9 = arith.constant dense<0.000000e+00> : vector<4x256xf32>
    %10 = tpu.matmul %9, %8, %cst_9 {dimension_numbers = #tpu.dot_dimension_numbers<[1], [0], [0], [1], [0, 0, 1, 1], [], []>} : vector<4x128xf32>, vector<128x256xf32>, vector<4x256xf32> -> vector<4x256xf32>
    %c0_10 = arith.constant 0 : index
    %c0_11 = arith.constant 0 : index
    %11 = vector.load %arg6[%c0_10, %c0_11] : memref<4x1xf32, #tpu.memory_space<vmem>>, vector<4x1xf32>
    %12 = vector.broadcast %11 : vector<4x1xf32> to vector<4x256xf32>
    %13 = arith.addf %10, %12 : vector<4x256xf32>
    %cst_12 = arith.constant 0.000000e+00 : f32
    %14 = vector.broadcast %cst_12 : f32 to vector<4x256xf32>
    %15 = arith.maximumf %13, %14 : vector<4x256xf32>
    %cst_13 = arith.constant dense<0.000000e+00> : vector<4xf32>
    %16 = vector.multi_reduction <add>, %15, %cst_13 [1] : vector<4x256xf32> to vector<4xf32>
    %17 = vector.shape_cast %16 : vector<4xf32> to vector<4x1xf32>
    %c0_14 = arith.constant 0 : index
    %c0_15 = arith.constant 0 : index
    %c0_16 = arith.constant 0 : index
    %c0_17 = arith.constant 0 : index
    %18 = vector.load %arg7[%c0_14, %c0_15, %c0_16, %c0_17] : memref<1x1x4x1xf32, #tpu.memory_space<vmem>>, vector<1x1x4x1xf32>
    %19 = vector.shape_cast %18 : vector<1x1x4x1xf32> to vector<4x1xf32>
    %20 = vector.shape_cast %17 : vector<4x1xf32> to vector<1x1x4x1xf32>
    tpu.vector_store %arg7[%c0_14, %c0_15, %c0_16, %c0_17], %20 {strides = array<i32>} : memref<1x1x4x1xf32, #tpu.memory_space<vmem>>, vector<1x1x4x1xf32>,
    %21 = arith.mulf %15, %15 : vector<4x256xf32>
    %cst_18 = arith.constant dense<0.000000e+00> : vector<4xf32>
    %22 = vector.multi_reduction <add>, %21, %cst_18 [1] : vector<4x256xf32> to vector<4xf32>
    %23 = vector.shape_cast %22 : vector<4xf32> to vector<4x1xf32>
    %c0_19 = arith.constant 0 : index
    %c0_20 = arith.constant 0 : index
    %c0_21 = arith.constant 0 : index
    %c0_22 = arith.constant 0 : index
    %24 = vector.load %arg8[%c0_19, %c0_20, %c0_21, %c0_22] : memref<1x1x4x1xf32, #tpu.memory_space<vmem>>, vector<1x1x4x1xf32>
    %25 = vector.shape_cast %24 : vector<1x1x4x1xf32> to vector<4x1xf32>
    %26 = vector.shape_cast %23 : vector<4x1xf32> to vector<1x1x4x1xf32>
    tpu.vector_store %arg8[%c0_19, %c0_20, %c0_21, %c0_22], %26 {strides = array<i32>} : memref<1x1x4x1xf32, #tpu.memory_space<vmem>>, vector<1x1x4x1xf32>,
    return
  }
  func.func @transform_0(%arg0: i32, %arg1: i32) -> (i32, i32, i32) {
    %c0_i32 = arith.constant 0 : i32
    %c0_i32_0 = arith.constant 0 : i32
    return %arg0, %c0_i32, %arg1 : i32, i32, i32
  }
  func.func @transform_1(%arg0: i32, %arg1: i32) -> (i32, i32) {
    %c0_i32 = arith.constant 0 : i32
    %c0_i32_0 = arith.constant 0 : i32
    %c0_i32_1 = arith.constant 0 : i32
    return %c0_i32, %c0_i32_0 : i32, i32
  }
  func.func @transform_2(%arg0: i32, %arg1: i32) -> (i32, i32) {
    %c0_i32 = arith.constant 0 : i32
    %c0_i32_0 = arith.constant 0 : i32
    %c0_i32_1 = arith.constant 0 : i32
    return %c0_i32, %c0_i32_0 : i32, i32
  }
  func.func @transform_3(%arg0: i32, %arg1: i32) -> (i32, i32) {
    %c0_i32 = arith.constant 0 : i32
    %c0_i32_0 = arith.constant 0 : i32
    %c0_i32_1 = arith.constant 0 : i32
    return %c0_i32, %c0_i32_0 : i32, i32
  }
  func.func @transform_4(%arg0: i32, %arg1: i32) -> (i32, i32) {
    %c0_i32 = arith.constant 0 : i32
    %c0_i32_0 = arith.constant 0 : i32
    %c0_i32_1 = arith.constant 0 : i32
    return %c0_i32, %c0_i32_0 : i32, i32
  }
  func.func @transform_5(%arg0: i32, %arg1: i32) -> (i32, i32, i32, i32) {
    %c0_i32 = arith.constant 0 : i32
    %c0_i32_0 = arith.constant 0 : i32
    %c0_i32_1 = arith.constant 0 : i32
    return %arg0, %arg1, %c0_i32, %c0_i32_0 : i32, i32, i32, i32
  }
  func.func @transform_6(%arg0: i32, %arg1: i32) -> (i32, i32, i32, i32) {
    %c0_i32 = arith.constant 0 : i32
    %c0_i32_0 = arith.constant 0 : i32
    %c0_i32_1 = arith.constant 0 : i32
    return %arg0, %arg1, %c0_i32, %c0_i32_0 : i32, i32, i32, i32
  }
}

</mosaic_0001>

<bundles_post_ra>
// kernel: predictor_forward.3
= control target key start
LH: loop header
LB: loop body
LE: loop exit
PB: predicated region body
PF: predicated region fallthrough
CT: control target
= control target key end

     0   :  { %s1040_s15 = smov 0   ;;  %s1042_s16 = smov 0   ;;  %s1314_s0 = inlined_call_operand.vmem [shape: f32[2,4,256], index: 0, kind: input, shape index: {}]   ;;  %s1315_s1 = inlined_call_operand.vmem [shape: f32[128,4], index: 1, kind: input, shape index: {}]   ;;  %s1316_s2 = inlined_call_operand.vmem [shape: f32[128,1], index: 2, kind: input, shape index: {}]   ;;  %s1317_s3 = inlined_call_operand.vmem [shape: f32[2,1,128,1], index: 3, kind: output, shape index: {0}]   ;;  %s1318_s4 = inlined_call_operand.vmem [shape: f32[2,1,128,1], index: 4, kind: output, shape index: {1}]  }
   0x1   :  { %s1044_s17 = smov 0  }
   0x2 LB: > { %s27_s18 = sadd.s32 1, %s1007_s16  ;;  %p928_p0 = scmp.ge.s32.totalorder %s1011_s17, 1  ;;  %s1011_s17 = sphi %s1044_s17, %s15_s17   ;;  %s1007_s16 = sphi %s1042_s16, %s1320_s16   ;;  %s1003_s15 = sphi %s1040_s15, %s1319_s15  }
   0x3   : > { %p29_p1 = scmp.ge.s32.totalorder %s27_s18, 2  ;;  %p188_p2 = scmp.lt.s32.totalorder %s1011_s17, 3 }
   0x5   : > { %s1322_s18 = smov (%p29_p1, %s27_s18), 0  ;;  %p189_p3 = pnand %p928_p0, %p188_p2 }
   0x6   : > { %p232_p4 = scmp.lt.s32.totalorder (!%p189_p3), %s1003_s15, 1  ;;  %v1013_v0 = vmov (!%p189_p3), 0.0   ;;  %v1014_v1 = vmov (!%p189_p3), 0   ;;  %v278_v2 = vld [vmem:[%s1316_s2 + $0x10] sm:$0xff] (!%p189_p3)  ;;  %vm423_vm0 = vcmask (!%p189_p3), 1043456   ;;  %v276_v4 = vld [vmem:[%s1316_s2] sm:$0xff] (!%p189_p3) }
   0x7   : > { %192 = sbr.rel (%p189_p3) target bundleno = 450 (0x1c2), region = 32  ;;  %492 = vmatprep.mubr.f32.mxu0 (!%p189_p3), %v1013_v0  ;;  %540 = vmatprep.mubr.f32.mxu1 (!%p189_p3), %v1013_v0  ;;  %v259_v6 = vld [vmem:[%s1315_s1] sm:$0xff] (!%p189_p3)  ;;  %vm374_vm1 = vcmask (!%p189_p3), 31744   ;;  %v279_v8 = vld [vmem:[%s1316_s2 + $0x18] sm:$0xff] (!%p189_p3)  ;;  %v277_v9 = vld [vmem:[%s1316_s2 + $0x8] sm:$0xff] (!%p189_p3)  ;;  %vm669_vm2 = vcmask (!%p189_p3), 7168  }
   0x8   : > { %987 = vset.pattern.permute.xlu1 (!%p189_p3), %v1014_v1  ;;  %986 = vset.pattern.permute.xlu0 (!%p189_p3), %v1014_v1  ;;  %v267_v7 = vld [vmem:[%s1315_s1 + $0x40] sm:$0xff] (!%p189_p3)  ;;  %v260_v10 = vld [vmem:[%s1315_s1 + $0x8] sm:$0xff] (!%p189_p3)  ;;  %v261_v14 = vld [vmem:[%s1315_s1 + $0x10] sm:$0xff] (!%p189_p3) }
   0x9   : > { %304 = vperm.xlu1 (!%p189_p3), %987, %v278_v2   ;;  %294 = vperm.xlu0 (!%p189_p3), %986, %v276_v4   ;;  %v268_v11 = vld [vmem:[%s1315_s1 + $0x48] sm:$0xff] (!%p189_p3)  ;;  %v280_v13 = vld [vmem:[%s1316_s2 + $0x20] sm:$0xff] (!%p189_p3)  ;;  %v269_v15 = vld [vmem:[%s1315_s1 + $0x50] sm:$0xff] (!%p189_p3) }
   0xa   : > { %v281_v12 = vld [vmem:[%s1316_s2 + $0x28] sm:$0xff] (!%p189_p3)  ;;  %v283_v16 = vld [vmem:[%s1316_s2 + $0x38] sm:$0xff] (!%p189_p3)  ;;  %v282_v17 = vld [vmem:[%s1316_s2 + $0x30] sm:$0xff] (!%p189_p3) }
   0xb   : > { %v262_v18 = vld [vmem:[%s1315_s1 + $0x18] sm:$0xff] (!%p189_p3)  ;;  %v285_v20 = vld [vmem:[%s1316_s2 + $0x48] sm:$0xff] (!%p189_p3)  ;;  %v284_v21 = vld [vmem:[%s1316_s2 + $0x40] sm:$0xff] (!%p189_p3) }
   0xc   : > { %v270_v19 = vld [vmem:[%s1315_s1 + $0x58] sm:$0xff] (!%p189_p3)  ;;  %v263_v22 = vld [vmem:[%s1315_s1 + $0x20] sm:$0xff] (!%p189_p3)  ;;  %v286_v25 = vld [vmem:[%s1316_s2 + $0x50] sm:$0xff] (!%p189_p3) }
   0xd   : > { %309 = vperm.xlu1 (!%p189_p3), %987, %v279_v8   ;;  %299 = vperm.xlu0 (!%p189_p3), %986, %v277_v9   ;;  %v271_v23 = vld [vmem:[%s1315_s1 + $0x60] sm:$0xff] (!%p189_p3)  ;;  %v287_v24 = vld [vmem:[%s1316_s2 + $0x58] sm:$0xff] (!%p189_p3)  ;;  %v264_v26 = vld [vmem:[%s1315_s1 + $0x28] sm:$0xff] (!%p189_p3) }
   0xe   : > { %s1324_s15 = smov (!%p232_p4, %s1003_s15), 1  ;;  %v272_v27 = vld [vmem:[%s1315_s1 + $0x68] sm:$0xff]  ;;  %v288_v29 = vld [vmem:[%s1316_s2 + $0x60] sm:$0xff]  ;;  %v265_v30 = vld [vmem:[%s1315_s1 + $0x30] sm:$0xff] }
   0xf   : > { %s955_s19 = sshll.u32 %s1324_s15, 3  ;;  %v289_v28 = vld [vmem:[%s1316_s2 + $0x68] sm:$0xff]  ;;  %v273_v31 = vld [vmem:[%s1315_s1 + $0x70] sm:$0xff]  ;;  %v291_v32 = vld [vmem:[%s1316_s2 + $0x78] sm:$0xff]  ;;  %s956_s21 = sshll.u32 %s1324_s15, 7 }
  0x10   : > { %s239_s22 = scalar_lea.vmem %s1314_s0, %s955_s19  ;;  %v290_v33 = vld [vmem:[%s1316_s2 + $0x70] sm:$0xff]  ;;  %v266_v34 = vld [vmem:[%s1315_s1 + $0x38] sm:$0xff]  ;;  %s1234_s24 = scalar_lea.vmem %s1317_s3, %s956_s21 }
  0x11   : > { %v275_v3 = vld [vmem:[%s239_s22] sm:$0xff]  ;;  %319 = vperm.xlu1 %987, %v281_v12   ;;  %314 = vperm.xlu0 %986, %v280_v13   ;;  %v274_v35 = vld [vmem:[%s1315_s1 + $0x78] sm:$0xff]  ;;  %s1241_s27 = scalar_lea.vmem %s1318_s4, %s956_s21 }
  0x12   : > { %v373_v5 = vcombine.high %v275_v3, %v275_v3 }
  0x14   : > { %935 = vmatprep.subr.msk.mxu0 %vm423_vm0, %v373_v5  ;;  %958 = vmatprep.subr.msk.mxu1 %vm423_vm0, %v373_v5 }
  0x15   : > { %936 = vmatpush1.msk.msra.mxu0 %vm423_vm0, %v275_v3  ;;  %959 = vmatpush1.msk.msra.mxu1 %vm423_vm0, %v275_v3 }
  0x16   : > { %937 = vmatmul.mubr.msk.f32.vlgmr.msra.gmra.mrb[0].mxu0 %vm374_vm1, %v259_v6  ;;  %945 = vmatmul.mubr.msk.f32.vlgmr.msra.gmra.mrb[0].mxu1 %vm374_vm1, %v267_v7 }
  0x17   : > { %498 = vmatprep.mubr.f32.mxu0 %v1013_v0  ;;  %546 = vmatprep.mubr.f32.mxu1 %v1013_v0 }
  0x18   : > { %329 = vperm.xlu1 %987, %v283_v16   ;;  %324 = vperm.xlu0 %986, %v282_v17  }
  0x1a   : > { %938 = vmatmul.mubr.msk.f32.gmra.mrb[2].mxu0 %vm374_vm1, %v260_v10  ;;  %946 = vmatmul.mubr.msk.f32.gmra.mrb[2].mxu1 %vm374_vm1, %v268_v11 }
  0x1b   : > { %504 = vmatprep.mubr.f32.mxu0 %v1013_v0  ;;  %552 = vmatprep.mubr.f32.mxu1 %v1013_v0 }
  0x1c   : > { %339 = vperm.xlu1 %987, %v285_v20   ;;  %334 = vperm.xlu0 %986, %v284_v21  }
  0x1e   : > { %939 = vmatmul.mubr.msk.f32.gmra.mrb[4].mxu0 %vm374_vm1, %v261_v14  ;;  %947 = vmatmul.mubr.msk.f32.gmra.mrb[4].mxu1 %vm374_vm1, %v269_v15 }
  0x1f   : > { %510 = vmatprep.mubr.f32.mxu0 %v1013_v0  ;;  %558 = vmatprep.mubr.f32.mxu1 %v1013_v0 }
  0x20   : > { %349 = vperm.xlu1 %987, %v287_v24   ;;  %344 = vperm.xlu0 %986, %v286_v25  }
  0x22   : > { %940 = vmatmul.mubr.msk.f32.gmra.mrb[6].mxu0 %vm374_vm1, %v262_v18  ;;  %948 = vmatmul.mubr.msk.f32.gmra.mrb[6].mxu1 %vm374_vm1, %v270_v19 }
  0x23   : > { %516 = vmatprep.mubr.f32.mxu0 %v1013_v0  ;;  %564 = vmatprep.mubr.f32.mxu1 %v1013_v0 }
  0x24   : > { %359 = vperm.xlu1 %987, %v289_v28   ;;  %354 = vperm.xlu0 %986, %v288_v29  }
  0x26   : > { %941 = vmatmul.mubr.msk.f32.gmra.mrb[8].mxu0 %vm374_vm1, %v263_v22  ;;  %949 = vmatmul.mubr.msk.f32.gmra.mrb[8].mxu1 %vm374_vm1, %v271_v23 }
  0x27   : > { %522 = vmatprep.mubr.f32.mxu0 %v1013_v0  ;;  %570 = vmatprep.mubr.f32.mxu1 %v1013_v0 }
  0x28   : > { %369 = vperm.xlu1 %987, %v291_v32   ;;  %364 = vperm.xlu0 %986, %v290_v33  }
  0x2a   : > { %942 = vmatmul.mubr.msk.f32.gmra.mrb[10].mxu0 %vm374_vm1, %v264_v26  ;;  %950 = vmatmul.mubr.msk.f32.gmra.mrb[10].mxu1 %vm374_vm1, %v272_v27 }
  0x2b   : > { %528 = vmatprep.mubr.f32.mxu0 %v1013_v0  ;;  %576 = vmatprep.mubr.f32.mxu1 %v1013_v0 }
  0x2e   : > { %943 = vmatmul.mubr.msk.f32.gmra.mrb[12].mxu0 %vm374_vm1, %v265_v30  ;;  %951 = vmatmul.mubr.msk.f32.gmra.mrb[12].mxu1 %vm374_vm1, %v273_v31 }
  0x2f   : > { %534 = vmatprep.mubr.f32.mxu0 %v1013_v0  ;;  %582 = vmatprep.mubr.f32.mxu1 %v1013_v0 }
  0x32   : > { %944 = vmatmul.mubr.msk.f32.gmra.mrb[14].mxu0 %vm374_vm1, %v266_v34  ;;  %952 = vmatmul.mubr.msk.f32.gmra.mrb[14].mxu1 %vm374_vm1, %v274_v35 }
  0x88   : > { %v295_v36 = vpop.permute.xlu0 %294  ;;  %v305_v37 = vpop.permute.xlu1 %304 }
  0x8c   : > { %v300_v38 = vpop.permute.xlu0 %299  ;;  %v1192_v39 = vpop.permute.xlu1 %309 }
  0x90   : > { %v1194_v40 = vpop.permute.xlu0 %314  ;;  %v1196_v41 = vpop.permute.xlu1 %319 }
  0x97   : > { %v1198_v42 = vpop.permute.xlu0 %324  ;;  %v1200_v43 = vpop.permute.xlu1 %329 }
  0x9b   : > { %v335_v44 = vpop.permute.xlu0 %334  ;;  %v340_v53 = vpop.permute.xlu1 %339 }
  0x9f   : > { %v345_v6 = vpop.permute.xlu0 %344  ;;  %v350_v27 = vpop.permute.xlu1 %349 }
  0xe9   : > { %v494_v45 = vpop.f32.mrb[0].mxu0  ;;  %v542_v46 = vpop.f32.mrb[0].mxu1 }
  0xea   : > { %v495_v47 = vadd.f32 %v494_v45, %v295_v36  ;;  %v543_v48 = vadd.f32 %v542_v46, %v335_v44  ;;  %v496_v49 = vpop.f32.mrb[1].mxu0  ;;  %v544_v50 = vpop.f32.mrb[1].mxu1 }
  0xeb   : > { %v497_v51 = vadd.f32 %v496_v49, %v295_v36  ;;  %v545_v52 = vadd.f32 %v544_v50, %v335_v44 }
  0xec   : > { %v589_v54 = vmax.f32 %v495_v47, 0.0  ;;  %v605_v55 = vmax.f32 %v543_v48, 0.0 }
  0xed   : > { %v590_v56 = vmax.f32 %v497_v51, 0.0  ;;  %v606_v57 = vmax.f32 %v545_v52, 0.0  ;;  %v500_v58 = vpop.f32.mrb[2].mxu0  ;;  %v548_v59 = vpop.f32.mrb[2].mxu1 }
  0xee   : > { %v686_v60 = vmul.f32 %v589_v54, %v589_v54  ;;  %v702_v61 = vmul.f32 %v605_v55, %v605_v55  ;;  %v501_v62 = vadd.f32 %v500_v58, %v300_v38  ;;  %v549_v63 = vadd.f32 %v548_v59, %v340_v53  ;;  %v502_v0 = vpop.f32.mrb[3].mxu0  ;;  %v550_v1 = vpop.f32.mrb[3].mxu1 }
  0xef   : > { %v687_v2 = vmul.f32 %v590_v56, %v590_v56  ;;  %v703_v3 = vmul.f32 %v606_v57, %v606_v57  ;;  %v503_v4 = vadd.f32 %v502_v0, %v300_v38  ;;  %v551_v5 = vadd.f32 %v550_v1, %v340_v53  ;;  %v355_v53 = vpop.permute.xlu0 %354 }
  0xf0   : > { %v591_v7 = vmax.f32 %v501_v62, 0.0  ;;  %v607_v8 = vmax.f32 %v549_v63, 0.0  ;;  %v645_v9 = vadd.f32 %v606_v57, %v605_v55  ;;  %v621_v10 = vadd.f32 %v590_v56, %v589_v54 }
  0xf1   : > { %v592_v11 = vmax.f32 %v503_v4, 0.0  ;;  %v608_v12 = vmax.f32 %v551_v5, 0.0  ;;  %v554_v13 = vpop.f32.mrb[4].mxu1  ;;  %v506_v14 = vpop.f32.mrb[4].mxu0  ;;  %v718_v15 = vadd.f32 %v687_v2, %v686_v60  ;;  %v742_v16 = vadd.f32 %v703_v3, %v702_v61 }
  0xf2   : > { %v688_v17 = vmul.f32 %v591_v7, %v591_v7  ;;  %v704_v18 = vmul.f32 %v607_v8, %v607_v8  ;;  %v555_v19 = vadd.f32 %v554_v13, %v345_v6  ;;  %646 = vadd.xlane.f32.xlu1 %v645_v9  ;;  %v507_v20 = vadd.f32 %v506_v14, %v305_v37  ;;  %v508_v21 = vpop.f32.mrb[5].mxu0  ;;  %v556_v22 = vpop.f32.mrb[5].mxu1 }
  0xf3   : > { %v689_v23 = vmul.f32 %v592_v11, %v592_v11  ;;  %v705_v24 = vmul.f32 %v608_v12, %v608_v12  ;;  %622 = vadd.xlane.f32.xlu0 %v621_v10  ;;  %v509_v25 = vadd.f32 %v508_v21, %v305_v37  ;;  %v557_v26 = vadd.f32 %v556_v22, %v345_v6  ;;  %v360_v9 = vpop.permute.xlu1 %359 }
  0xf4   : > { %v609_v28 = vmax.f32 %v555_v19, 0.0  ;;  %v593_v29 = vmax.f32 %v507_v20, 0.0  ;;  %v648_v30 = vadd.f32 %v608_v12, %v607_v8  ;;  %v624_v31 = vadd.f32 %v592_v11, %v591_v7 }
  0xf5   : > { %v594_v32 = vmax.f32 %v509_v25, 0.0  ;;  %v610_v33 = vmax.f32 %v557_v26, 0.0  ;;  %v512_v34 = vpop.f32.mrb[6].mxu0  ;;  %v560_v35 = vpop.f32.mrb[6].mxu1  ;;  %v721_v36 = vadd.f32 %v689_v23, %v688_v17  ;;  %v745_v38 = vadd.f32 %v705_v24, %v704_v18 }
  0xf6   : > { %v706_v44 = vmul.f32 %v609_v28, %v609_v28  ;;  %v690_v45 = vmul.f32 %v593_v29, %v593_v29  ;;  %v513_v46 = vadd.f32 %v512_v34, %v1192_v39  ;;  %v561_v47 = vadd.f32 %v560_v35, %v350_v27  ;;  %719 = vadd.xlane.f32.xlu1 %v718_v15  ;;  %v514_v48 = vpop.f32.mrb[7].mxu0  ;;  %v562_v37 = vpop.f32.mrb[7].mxu1 }
  0xf7   : > { %v691_v49 = vmul.f32 %v594_v32, %v594_v32  ;;  %v707_v50 = vmul.f32 %v610_v33, %v610_v33  ;;  %649 = vadd.xlane.f32.xlu0 %v648_v30  ;;  %v515_v51 = vadd.f32 %v514_v48, %v1192_v39  ;;  %v563_v52 = vadd.f32 %v562_v37, %v350_v27 }
  0xf8   : > { %v595_v54 = vmax.f32 %v513_v46, 0.0  ;;  %v611_v55 = vmax.f32 %v561_v47, 0.0  ;;  %v651_v56 = vadd.f32 %v610_v33, %v609_v28  ;;  %v627_v57 = vadd.f32 %v594_v32, %v593_v29  ;;  %v365_v29 = vpop.permute.xlu0 %364 }
  0xf9   : > { %v596_v58 = vmax.f32 %v515_v51, 0.0  ;;  %v612_v59 = vmax.f32 %v563_v52, 0.0  ;;  %v518_v60 = vpop.f32.mrb[8].mxu0  ;;  %v566_v61 = vpop.f32.mrb[8].mxu1  ;;  %v1204_v62 = vadd.f32 %v691_v49, %v690_v45  ;;  %v1206_v63 = vadd.f32 %v707_v50, %v706_v44 }
  0xfa   : > { %v692_v0 = vmul.f32 %v595_v54, %v595_v54  ;;  %v708_v1 = vmul.f32 %v611_v55, %v611_v55  ;;  %v519_v2 = vadd.f32 %v518_v60, %v1194_v40  ;;  %v567_v3 = vadd.f32 %v566_v61, %v355_v53  ;;  %743 = vadd.xlane.f32.xlu1 %v742_v16  ;;  %v520_v39 = vpop.f32.mrb[9].mxu0  ;;  %v568_v4 = vpop.f32.mrb[9].mxu1 }
  0xfb   : > { %v693_v5 = vmul.f32 %v596_v58, %v596_v58  ;;  %v709_v6 = vmul.f32 %v612_v59, %v612_v59  ;;  %722 = vadd.xlane.f32.xlu0 %v721_v36  ;;  %v521_v7 = vadd.f32 %v520_v39, %v1194_v40  ;;  %v569_v8 = vadd.f32 %v568_v4, %v355_v53 }
  0xfc   : > { %v597_v10 = vmax.f32 %v519_v2, 0.0  ;;  %v613_v11 = vmax.f32 %v567_v3, 0.0  ;;  %v1210_v12 = vadd.f32 %v596_v58, %v595_v54  ;;  %v1212_v13 = vadd.f32 %v612_v59, %v611_v55  ;;  %v370_v54 = vpop.permute.xlu1 %369 }
  0xfd   : > { %v598_v14 = vmax.f32 %v521_v7, 0.0  ;;  %v614_v15 = vmax.f32 %v569_v8, 0.0  ;;  %v524_v17 = vpop.f32.mrb[10].mxu0  ;;  %v572_v18 = vpop.f32.mrb[10].mxu1  ;;  %v1214_v16 = vadd.f32 %v693_v5, %v692_v0  ;;  %v1216_v19 = vadd.f32 %v709_v6, %v708_v1 }
  0xfe   : > { %v694_v20 = vmul.f32 %v597_v10, %v597_v10  ;;  %v710_v21 = vmul.f32 %v613_v11, %v613_v11  ;;  %v525_v40 = vadd.f32 %v524_v17, %v1196_v41  ;;  %v573_v22 = vadd.f32 %v572_v18, %v360_v9  ;;  %625 = vadd.xlane.f32.xlu1 %v624_v31  ;;  %v526_v23 = vpop.f32.mrb[11].mxu0  ;;  %v574_v24 = vpop.f32.mrb[11].mxu1 }
  0xff   : > { %v695_v25 = vmul.f32 %v598_v14, %v598_v14  ;;  %v711_v26 = vmul.f32 %v614_v15, %v614_v15  ;;  %746 = vadd.xlane.f32.xlu0 %v745_v38  ;;  %v527_v27 = vadd.f32 %v526_v23, %v1196_v41  ;;  %v575_v28 = vadd.f32 %v574_v24, %v360_v9 }
 0x100   : > { %v599_v30 = vmax.f32 %v525_v40, 0.0  ;;  %v615_v32 = vmax.f32 %v573_v22, 0.0  ;;  %v633_v33 = vadd.f32 %v598_v14, %v597_v10  ;;  %v657_v34 = vadd.f32 %v614_v15, %v613_v11 }
 0x101   : > { %v600_v35 = vmax.f32 %v527_v27, 0.0  ;;  %v616_v36 = vmax.f32 %v575_v28, 0.0  ;;  %v530_v44 = vpop.f32.mrb[12].mxu0  ;;  %v578_v45 = vpop.f32.mrb[12].mxu1  ;;  %v730_v46 = vadd.f32 %v695_v25, %v694_v20  ;;  %v754_v47 = vadd.f32 %v711_v26, %v710_v21 }
 0x102   : > { %v696_v31 = vmul.f32 %v599_v30, %v599_v30  ;;  %v712_v48 = vmul.f32 %v615_v32, %v615_v32  ;;  %v531_v37 = vadd.f32 %v530_v44, %v1198_v42  ;;  %v579_v49 = vadd.f32 %v578_v45, %v365_v29  ;;  %652 = vadd.xlane.f32.xlu1 %v651_v56  ;;  %v532_v38 = vpop.f32.mrb[13].mxu0  ;;  %v580_v41 = vpop.f32.mrb[13].mxu1 }
 0x103   : > { %v697_v50 = vmul.f32 %v600_v35, %v600_v35  ;;  %v713_v51 = vmul.f32 %v616_v36, %v616_v36  ;;  %628 = vadd.xlane.f32.xlu0 %v627_v57  ;;  %v533_v52 = vadd.f32 %v532_v38, %v1198_v42  ;;  %v581_v53 = vadd.f32 %v580_v41, %v365_v29 }
 0x104   : > { %v601_v55 = vmax.f32 %v531_v37, 0.0  ;;  %v617_v58 = vmax.f32 %v579_v49, 0.0  ;;  %v636_v59 = vadd.f32 %v600_v35, %v599_v30  ;;  %v660_v60 = vadd.f32 %v616_v36, %v615_v32 }
 0x105   : > { %v602_v61 = vmax.f32 %v533_v52, 0.0  ;;  %v618_v0 = vmax.f32 %v581_v53, 0.0  ;;  %v536_v1 = vpop.f32.mrb[14].mxu0  ;;  %v584_v2 = vpop.f32.mrb[14].mxu1  ;;  %v733_v3 = vadd.f32 %v697_v50, %v696_v31  ;;  %v757_v39 = vadd.f32 %v713_v51, %v712_v48 }
 0x106   : > { %v698_v56 = vmul.f32 %v601_v55, %v601_v55  ;;  %v714_v4 = vmul.f32 %v617_v58, %v617_v58  ;;  %v537_v5 = vadd.f32 %v536_v1, %v1200_v43  ;;  %v585_v6 = vadd.f32 %v584_v2, %v370_v54  ;;  %725 = vadd.xlane.f32.xlu1 %v1204_v62  ;;  %v538_v42 = vpop.f32.mrb[15].mxu0  ;;  %v586_v57 = vpop.f32.mrb[15].mxu1 }
 0x107   : > { %v699_v7 = vmul.f32 %v602_v61, %v602_v61  ;;  %v715_v8 = vmul.f32 %v618_v0, %v618_v0  ;;  %631 = vadd.xlane.f32.xlu0 %v1210_v12  ;;  %v539_v9 = vadd.f32 %v538_v42, %v1200_v43  ;;  %v587_v10 = vadd.f32 %v586_v57, %v370_v54 }
 0x108   : > { %v603_v11 = vmax.f32 %v537_v5, 0.0  ;;  %v619_v14 = vmax.f32 %v585_v6, 0.0  ;;  %v639_v15 = vadd.f32 %v602_v61, %v601_v55  ;;  %v663_v17 = vadd.f32 %v618_v0, %v617_v58 }
 0x109   : > { %v604_v18 = vmax.f32 %v539_v9, 0.0  ;;  %v620_v20 = vmax.f32 %v587_v10, 0.0  ;;  %v736_v21 = vadd.f32 %v699_v7, %v698_v56  ;;  %v760_v40 = vadd.f32 %v715_v8, %v714_v4 }
 0x10a   : > { %v700_v22 = vmul.f32 %v603_v11, %v603_v11  ;;  %v716_v23 = vmul.f32 %v619_v14, %v619_v14  ;;  %749 = vadd.xlane.f32.xlu1 %v1206_v63 }
 0x10b   : > { %v701_v62 = vmul.f32 %v604_v18, %v604_v18  ;;  %v717_v24 = vmul.f32 %v620_v20, %v620_v20  ;;  %655 = vadd.xlane.f32.xlu0 %v1212_v13  ;;  %v642_v12 = vadd.f32 %v604_v18, %v603_v11  ;;  %v666_v25 = vadd.f32 %v620_v20, %v619_v14 }
 0x10d   : > { %v739_v43 = vadd.f32 %v701_v62, %v700_v22  ;;  %v763_v26 = vadd.f32 %v717_v24, %v716_v23 }
 0x10e   : > { %634 = vadd.xlane.f32.xlu1 %v633_v33 }
 0x10f   : > { %728 = vadd.xlane.f32.xlu0 %v1214_v16 }
 0x112   : > { %658 = vadd.xlane.f32.xlu1 %v657_v34 }
 0x113   : > { %752 = vadd.xlane.f32.xlu0 %v1216_v19 }
 0x116   : > { %731 = vadd.xlane.f32.xlu1 %v730_v46 }
 0x117   : > { %637 = vadd.xlane.f32.xlu0 %v636_v59 }
 0x11a   : > { %755 = vadd.xlane.f32.xlu1 %v754_v47 }
 0x11b   : > { %661 = vadd.xlane.f32.xlu0 %v660_v60 }
 0x11e   : > { %640 = vadd.xlane.f32.xlu1 %v639_v15 }
 0x11f   : > { %734 = vadd.xlane.f32.xlu0 %v733_v3 }
 0x122   : > { %664 = vadd.xlane.f32.xlu1 %v663_v17 }
 0x123   : > { %758 = vadd.xlane.f32.xlu0 %v757_v39 }
 0x126   : > { %737 = vadd.xlane.f32.xlu1 %v736_v21 }
 0x127   : > { %643 = vadd.xlane.f32.xlu0 %v642_v12 }
 0x12a   : > { %761 = vadd.xlane.f32.xlu1 %v760_v40 }
 0x12b   : > { %667 = vadd.xlane.f32.xlu0 %v666_v25 }
 0x12f   : > { %740 = vadd.xlane.f32.xlu0 %v739_v43 }
 0x133   : > { %764 = vadd.xlane.f32.xlu0 %v763_v26 }
 0x17f   : > { %v647_v63 = vpop.xlane.xlu1 %646 }
 0x180   : > { %678 = vst.msk [vmem:[%s1234_s24 + $0x40] sm:$0xff] %vm669_vm2, %v647_v63  ;;  %v623_v13 = vpop.xlane.xlu0 %622 }
 0x181   : > { %670 = vst.msk [vmem:[%s1234_s24] sm:$0xff] %vm669_vm2, %v623_v13 }
 0x183   : > { %v720_v16 = vpop.xlane.xlu1 %719 }
 0x184   : > { %766 = vst.msk [vmem:[%s1241_s27] sm:$0xff] %vm669_vm2, %v720_v16  ;;  %v650_v19 = vpop.xlane.xlu0 %649 }
 0x185   : > { %679 = vst.msk [vmem:[%s1234_s24 + $0x48] sm:$0xff] %vm669_vm2, %v650_v19 }
 0x187   : > { %v744_v27 = vpop.xlane.xlu1 %743 }
 0x188   : > { %774 = vst.msk [vmem:[%s1241_s27 + $0x40] sm:$0xff] %vm669_vm2, %v744_v27  ;;  %v723_v28 = vpop.xlane.xlu0 %722 }
 0x189   : > { %767 = vst.msk [vmem:[%s1241_s27 + $0x8] sm:$0xff] %vm669_vm2, %v723_v28 }
 0x18b   : > { %v626_v29 = vpop.xlane.xlu1 %625 }
 0x18c   : > { %671 = vst.msk [vmem:[%s1234_s24 + $0x8] sm:$0xff] %vm669_vm2, %v626_v29  ;;  %v747_v30 = vpop.xlane.xlu0 %746 }
 0x18d   : > { %775 = vst.msk [vmem:[%s1241_s27 + $0x48] sm:$0xff] %vm669_vm2, %v747_v30 }
 0x18f   : > { %v653_v32 = vpop.xlane.xlu1 %652 }
 0x190   : > { %680 = vst.msk [vmem:[%s1234_s24 + $0x50] sm:$0xff] %vm669_vm2, %v653_v32  ;;  %v629_v33 = vpop.xlane.xlu0 %628 }
 0x191   : > { %672 = vst.msk [vmem:[%s1234_s24 + $0x10] sm:$0xff] %vm669_vm2, %v629_v33 }
 0x193   : > { %v726_v34 = vpop.xlane.xlu1 %725 }
 0x194   : > { %768 = vst.msk [vmem:[%s1241_s27 + $0x10] sm:$0xff] %vm669_vm2, %v726_v34  ;;  %v632_v35 = vpop.xlane.xlu0 %631 }
 0x195   : > { %673 = vst.msk [vmem:[%s1234_s24 + $0x18] sm:$0xff] %vm669_vm2, %v632_v35 }
 0x197   : > { %v750_v36 = vpop.xlane.xlu1 %749 }
 0x198   : > { %776 = vst.msk [vmem:[%s1241_s27 + $0x50] sm:$0xff] %vm669_vm2, %v750_v36  ;;  %v656_v44 = vpop.xlane.xlu0 %655 }
 0x199   : > { %681 = vst.msk [vmem:[%s1234_s24 + $0x58] sm:$0xff] %vm669_vm2, %v656_v44 }
 0x19b   : > { %v635_v45 = vpop.xlane.xlu1 %634 }
 0x19c   : > { %674 = vst.msk [vmem:[%s1234_s24 + $0x20] sm:$0xff] %vm669_vm2, %v635_v45  ;;  %v729_v46 = vpop.xlane.xlu0 %728 }
 0x19d   : > { %769 = vst.msk [vmem:[%s1241_s27 + $0x18] sm:$0xff] %vm669_vm2, %v729_v46 }
 0x19f   : > { %v659_v47 = vpop.xlane.xlu1 %658 }
 0x1a0   : > { %682 = vst.msk [vmem:[%s1234_s24 + $0x60] sm:$0xff] %vm669_vm2, %v659_v47  ;;  %v753_v31 = vpop.xlane.xlu0 %752 }
 0x1a1   : > { %777 = vst.msk [vmem:[%s1241_s27 + $0x58] sm:$0xff] %vm669_vm2, %v753_v31 }
 0x1a3   : > { %v732_v48 = vpop.xlane.xlu1 %731 }
 0x1a4   : > { %770 = vst.msk [vmem:[%s1241_s27 + $0x20] sm:$0xff] %vm669_vm2, %v732_v48  ;;  %v638_v37 = vpop.xlane.xlu0 %637 }
 0x1a5   : > { %675 = vst.msk [vmem:[%s1234_s24 + $0x28] sm:$0xff] %vm669_vm2, %v638_v37 }
 0x1a7   : > { %v756_v49 = vpop.xlane.xlu1 %755 }
 0x1a8   : > { %778 = vst.msk [vmem:[%s1241_s27 + $0x60] sm:$0xff] %vm669_vm2, %v756_v49  ;;  %v662_v38 = vpop.xlane.xlu0 %661 }
 0x1a9   : > { %683 = vst.msk [vmem:[%s1234_s24 + $0x68] sm:$0xff] %vm669_vm2, %v662_v38 }
 0x1ab   : > { %v641_v41 = vpop.xlane.xlu1 %640 }
 0x1ac   : > { %676 = vst.msk [vmem:[%s1234_s24 + $0x30] sm:$0xff] %vm669_vm2, %v641_v41  ;;  %v735_v50 = vpop.xlane.xlu0 %734 }
 0x1ad   : > { %771 = vst.msk [vmem:[%s1241_s27 + $0x28] sm:$0xff] %vm669_vm2, %v735_v50 }
 0x1af   : > { %v665_v51 = vpop.xlane.xlu1 %664 }
 0x1b0   : > { %684 = vst.msk [vmem:[%s1234_s24 + $0x70] sm:$0xff] %vm669_vm2, %v665_v51  ;;  %v759_v52 = vpop.xlane.xlu0 %758 }
 0x1b1   : > { %779 = vst.msk [vmem:[%s1241_s27 + $0x68] sm:$0xff] %vm669_vm2, %v759_v52 }
 0x1b3   : > { %v738_v53 = vpop.xlane.xlu1 %737 }
 0x1b4   : > { %772 = vst.msk [vmem:[%s1241_s27 + $0x30] sm:$0xff] %vm669_vm2, %v738_v53  ;;  %v644_v54 = vpop.xlane.xlu0 %643 }
 0x1b5   : > { %677 = vst.msk [vmem:[%s1234_s24 + $0x38] sm:$0xff] %vm669_vm2, %v644_v54 }
 0x1b7   : > { %v762_v55 = vpop.xlane.xlu1 %761 }
 0x1b8   : > { %780 = vst.msk [vmem:[%s1241_s27 + $0x70] sm:$0xff] %vm669_vm2, %v762_v55  ;;  %v668_v58 = vpop.xlane.xlu0 %667 }
 0x1b9   : > { %685 = vst.msk [vmem:[%s1234_s24 + $0x78] sm:$0xff] %vm669_vm2, %v668_v58 }
 0x1bc   : > { %v741_v59 = vpop.xlane.xlu0 %740 }
 0x1bd   : > { %773 = vst.msk [vmem:[%s1241_s27 + $0x38] sm:$0xff] %vm669_vm2, %v741_v59 }
 0x1c0   : > { %v765_v60 = vpop.xlane.xlu0 %764 }
 0x1c1   : > { %781 = vst.msk [vmem:[%s1241_s27 + $0x78] sm:$0xff] %vm669_vm2, %v765_v60 }
 0x1c2 PF: > { %s15_s17 = sadd.s32 1, %s1011_s17   ;;  %s1319_s15 = smov %s1007_s16 }
 0x1c3   : > { %p12_p5 = scmp.ge.s32.totalorder %s15_s17, 4   ;;  %s1320_s16 = smov %s1322_s18 }
 0x1c5   :  { %14 = sbr.rel (!%p12_p5) target bundleno = 2 (0x2), region = 74 }

// kernel: predictor_forward.5
= control target key start
LH: loop header
LB: loop body
LE: loop exit
PB: predicated region body
PF: predicated region fallthrough
CT: control target
= control target key end

     0   :  { %s1052_s24 = smov 0   ;;  %s1054_s25 = smov 0   ;;  %s1237_s0 = inlined_call_operand.vmem [shape: f32[2,4,256], index: 0, kind: input, shape index: {}]   ;;  %s1238_s1 = inlined_call_operand.vmem [shape: f32[128,4], index: 1, kind: input, shape index: {}]   ;;  %s1239_s2 = inlined_call_operand.vmem [shape: f32[128,1], index: 2, kind: input, shape index: {}]   ;;  %s1240_s3 = inlined_call_operand.vmem [shape: f32[4,128], index: 3, kind: input, shape index: {}]   ;;  %s1241_s4 = inlined_call_operand.vmem [shape: f32[4,1], index: 4, kind: input, shape index: {}]   ;;  %s1242_s5 = inlined_call_operand.vmem [shape: f32[4,1], index: 5, kind: input, shape index: {}]   ;;  %s1243_s6 = inlined_call_operand.vmem [shape: f32[4,1], index: 6, kind: input, shape index: {}]   ;;  %s1244_s7 = inlined_call_operand.vmem [shape: f32[2,4,256], index: 7, kind: output, shape index: {}]  }
   0x1   :  { %s1056_s26 = smov 0  }
   0x2 LB: > { %s29_s27 = sadd.s32 1, %s1004_s25  ;;  %p894_p0 = scmp.ge.s32.totalorder %s1008_s26, 1  ;;  %s1008_s26 = sphi %s1056_s26, %s17_s26   ;;  %s1004_s25 = sphi %s1054_s25, %s1246_s25   ;;  %s1000_s24 = sphi %s1052_s24, %s1245_s24  }
   0x3   : > { %p31_p1 = scmp.ge.s32.totalorder %s29_s27, 2  ;;  %p258_p2 = scmp.lt.s32.totalorder %s1008_s26, 3 }
   0x5   : > { %s1248_s27 = smov (%p31_p1, %s29_s27), 0  ;;  %p259_p3 = pnand %p894_p0, %p258_p2 }
   0x6   : > { %p299_p4 = scmp.lt.s32.totalorder (!%p259_p3), %s1000_s24, 1  ;;  %v1010_v0 = vmov (!%p259_p3), 0.0   ;;  %v1011_v1 = vmov (!%p259_p3), 0   ;;  %v335_v2 = vld [vmem:[%s1239_s2] sm:$0xff] (!%p259_p3)  ;;  %vm482_vm0 = vcmask (!%p259_p3), 1043456   ;;  %v337_v4 = vld [vmem:[%s1239_s2 + $0x10] sm:$0xff] (!%p259_p3) }
   0x7   : > { %262 = sbr.rel (%p259_p3) target bundleno = 559 (0x22f), region = 48  ;;  %551 = vmatprep.mubr.f32.mxu0 (!%p259_p3), %v1010_v0  ;;  %751 = vmatprep.mubr.f32.mxu1 (!%p259_p3), %v1010_v0  ;;  %v336_v6 = vld [vmem:[%s1239_s2 + $0x8] sm:$0xff] (!%p259_p3)  ;;  %v318_v7 = vld [vmem:[%s1238_s1] sm:$0xff] (!%p259_p3)  ;;  %vm433_vm1 = vcmask (!%p259_p3), 31744   ;;  %v338_v8 = vld [vmem:[%s1239_s2 + $0x18] sm:$0xff] (!%p259_p3) }
   0x8   : > { %979 = vset.pattern.permute.xlu0 (!%p259_p3), %v1011_v1  ;;  %980 = vset.pattern.permute.xlu1 (!%p259_p3), %v1011_v1  ;;  %v339_v9 = vld [vmem:[%s1239_s2 + $0x20] sm:$0xff] (!%p259_p3)  ;;  %v319_v10 = vld [vmem:[%s1238_s1 + $0x8] sm:$0xff] (!%p259_p3)  ;;  %v341_v12 = vld [vmem:[%s1239_s2 + $0x30] sm:$0xff] (!%p259_p3) }
   0x9   : > { %353 = vperm.xlu0 (!%p259_p3), %979, %v335_v2   ;;  %363 = vperm.xlu1 (!%p259_p3), %980, %v337_v4   ;;  %v340_v11 = vld [vmem:[%s1239_s2 + $0x28] sm:$0xff] (!%p259_p3)  ;;  %v320_v13 = vld [vmem:[%s1238_s1 + $0x10] sm:$0xff] (!%p259_p3)  ;;  %v342_v14 = vld [vmem:[%s1239_s2 + $0x38] sm:$0xff] (!%p259_p3) }
   0xa   : > { %v343_v15 = vld [vmem:[%s1239_s2 + $0x40] sm:$0xff] (!%p259_p3)  ;;  %v321_v16 = vld [vmem:[%s1238_s1 + $0x18] sm:$0xff] (!%p259_p3)  ;;  %v344_v17 = vld [vmem:[%s1239_s2 + $0x48] sm:$0xff] (!%p259_p3) }
   0xb   : > { %v345_v18 = vld [vmem:[%s1239_s2 + $0x50] sm:$0xff] (!%p259_p3)  ;;  %v322_v19 = vld [vmem:[%s1238_s1 + $0x20] sm:$0xff] (!%p259_p3)  ;;  %v346_v20 = vld [vmem:[%s1239_s2 + $0x58] sm:$0xff] (!%p259_p3) }
   0xc   : > { %v347_v21 = vld [vmem:[%s1239_s2 + $0x60] sm:$0xff] (!%p259_p3)  ;;  %v323_v22 = vld [vmem:[%s1238_s1 + $0x28] sm:$0xff] (!%p259_p3)  ;;  %v349_v24 = vld [vmem:[%s1239_s2 + $0x70] sm:$0xff] (!%p259_p3) }
   0xd   : > { %358 = vperm.xlu0 (!%p259_p3), %979, %v336_v6   ;;  %368 = vperm.xlu1 (!%p259_p3), %980, %v338_v8   ;;  %v348_v23 = vld [vmem:[%s1239_s2 + $0x68] sm:$0xff] (!%p259_p3)  ;;  %v324_v25 = vld [vmem:[%s1238_s1 + $0x30] sm:$0xff] (!%p259_p3)  ;;  %v350_v26 = vld [vmem:[%s1239_s2 + $0x78] sm:$0xff] (!%p259_p3) }
   0xe   : > { %s1250_s24 = smov (!%p299_p4, %s1000_s24), 1  ;;  %v681_v27 = vld [vmem:[%s1241_s4] sm:$0xf]  ;;  %v325_v28 = vld [vmem:[%s1238_s1 + $0x38] sm:$0xff]  ;;  %v327_v32 = vld [vmem:[%s1238_s1 + $0x48] sm:$0xff] }
   0xf   : > { %s919_s28 = sshll.u32 %s1250_s24, 3  ;;  %v760_v29 = vld [vmem:[%s1242_s5] sm:$0xf]  ;;  %v328_v33 = vld [vmem:[%s1238_s1 + $0x50] sm:$0xff]  ;;  %v329_v34 = vld [vmem:[%s1238_s1 + $0x58] sm:$0xff] }
  0x10   : > { %s306_s8 = scalar_lea.vmem %s1237_s0, %s919_s28  ;;  %v768_v30 = vld [vmem:[%s1243_s6] sm:$0xf]  ;;  %v331_v36 = vld [vmem:[%s1238_s1 + $0x68] sm:$0xff]  ;;  %v332_v37 = vld [vmem:[%s1238_s1 + $0x70] sm:$0xff]  ;;  %s316_s11 = scalar_lea.vmem %s1244_s7, %s919_s28 }
  0x11   : > { %v334_v3 = vld [vmem:[%s306_s8] sm:$0xff]  ;;  %373 = vperm.xlu0 %979, %v339_v9   ;;  %378 = vperm.xlu1 %980, %v340_v11   ;;  %v333_v38 = vld [vmem:[%s1238_s1 + $0x78] sm:$0xff] }
  0x12   : > { %v432_v5 = vcombine.high %v334_v3, %v334_v3  ;;  %v326_v31 = vld [vmem:[%s1238_s1 + $0x40] sm:$0xff] }
  0x13   : > { %v330_v35 = vld [vmem:[%s1238_s1 + $0x60] sm:$0xff] }
  0x14   : > { %899 = vmatprep.subr.msk.mxu0 %vm482_vm0, %v432_v5 }
  0x15   : > { %900 = vmatpush1.msk.msra.mxu0 %vm482_vm0, %v334_v3  ;;  %383 = vperm.xlu0 %979, %v341_v12  }
  0x16   : > { %901 = vmatmul.mubr.msk.f32.vlgmr.msra.gmra.mrb[0].mxu0 %vm433_vm1, %v318_v7  ;;  %388 = vperm.xlu1 %980, %v342_v14  }
  0x17   : > { %557 = vmatprep.mubr.f32.mxu0 %v1010_v0 }
  0x19   : > { %393 = vperm.xlu0 %979, %v343_v15  }
  0x1a   : > { %902 = vmatmul.mubr.msk.f32.gmra.mrb[2].mxu0 %vm433_vm1, %v319_v10  ;;  %398 = vperm.xlu1 %980, %v344_v17  }
  0x1b   : > { %563 = vmatprep.mubr.f32.mxu0 %v1010_v0 }
  0x1d   : > { %403 = vperm.xlu0 %979, %v345_v18  }
  0x1e   : > { %903 = vmatmul.mubr.msk.f32.gmra.mrb[4].mxu0 %vm433_vm1, %v320_v13  ;;  %408 = vperm.xlu1 %980, %v346_v20  }
  0x1f   : > { %569 = vmatprep.mubr.f32.mxu0 %v1010_v0 }
  0x21   : > { %413 = vperm.xlu0 %979, %v347_v21  }
  0x22   : > { %904 = vmatmul.mubr.msk.f32.gmra.mrb[6].mxu0 %vm433_vm1, %v321_v16  ;;  %418 = vperm.xlu1 %980, %v348_v23  }
  0x23   : > { %575 = vmatprep.mubr.f32.mxu0 %v1010_v0 }
  0x25   : > { %423 = vperm.xlu0 %979, %v349_v24  }
  0x26   : > { %905 = vmatmul.mubr.msk.f32.gmra.mrb[8].mxu0 %vm433_vm1, %v322_v19  ;;  %428 = vperm.xlu1 %980, %v350_v26  }
  0x27   : > { %581 = vmatprep.mubr.f32.mxu0 %v1010_v0 }
  0x29   : > { %684 = vperm.xlu0 %979, %v681_v27  }
  0x2a   : > { %906 = vmatmul.mubr.msk.f32.gmra.mrb[10].mxu0 %vm433_vm1, %v323_v22  ;;  %763 = vperm.xlu1 %980, %v760_v29  }
  0x2b   : > { %587 = vmatprep.mubr.f32.mxu0 %v1010_v0 }
  0x2d   : > { %771 = vperm.xlu0 %979, %v768_v30  }
  0x2e   : > { %907 = vmatmul.mubr.msk.f32.gmra.mrb[12].mxu0 %vm433_vm1, %v324_v25 }
  0x2f   : > { %593 = vmatprep.mubr.f32.mxu0 %v1010_v0 }
  0x32   : > { %908 = vmatmul.mubr.msk.f32.gmra.mrb[14].mxu0 %vm433_vm1, %v325_v28 }
  0x33   : > { %599 = vmatprep.mubr.f32.mxu0 %v1010_v0 }
  0x36   : > { %909 = vmatmul.mubr.msk.f32.gmra.mrb[16].mxu0 %vm433_vm1, %v326_v31 }
  0x37   : > { %605 = vmatprep.mubr.f32.mxu0 %v1010_v0 }
  0x3a   : > { %910 = vmatmul.mubr.msk.f32.gmra.mrb[18].mxu0 %vm433_vm1, %v327_v32 }
  0x3b   : > { %611 = vmatprep.mubr.f32.mxu0 %v1010_v0 }
  0x3e   : > { %911 = vmatmul.mubr.msk.f32.gmra.mrb[20].mxu0 %vm433_vm1, %v328_v33 }
  0x3f   : > { %617 = vmatprep.mubr.f32.mxu0 %v1010_v0 }
  0x42   : > { %912 = vmatmul.mubr.msk.f32.gmra.mrb[22].mxu0 %vm433_vm1, %v329_v34 }
  0x43   : > { %623 = vmatprep.mubr.f32.mxu0 %v1010_v0 }
  0x46   : > { %913 = vmatmul.mubr.msk.f32.gmra.mrb[24].mxu0 %vm433_vm1, %v330_v35 }
  0x47   : > { %629 = vmatprep.mubr.f32.mxu0 %v1010_v0 }
  0x4a   : > { %914 = vmatmul.mubr.msk.f32.gmra.mrb[26].mxu0 %vm433_vm1, %v331_v36 }
  0x4b   : > { %635 = vmatprep.mubr.f32.mxu0 %v1010_v0 }
  0x4e   : > { %915 = vmatmul.mubr.msk.f32.gmra.mrb[28].mxu0 %vm433_vm1, %v332_v37 }
  0x4f   : > { %641 = vmatprep.mubr.f32.mxu0 %v1010_v0 }
  0x52   : > { %916 = vmatmul.mubr.msk.f32.gmra.mrb[30].mxu0 %vm433_vm1, %v333_v38 }
  0x88   : > { %v354_v39 = vpop.permute.xlu0 %353  ;;  %v364_v48 = vpop.permute.xlu1 %363 }
  0x8c   : > { %v359_v43 = vpop.permute.xlu0 %358  ;;  %v369_v59 = vpop.permute.xlu1 %368 }
  0x90   : > { %v374_v8 = vpop.permute.xlu0 %373  ;;  %v379_v11 = vpop.permute.xlu1 %378 }
  0x94   : > { %v384_v24 = vpop.permute.xlu0 %383 }
  0x95   : > { %v389_v27 = vpop.permute.xlu1 %388 }
  0xe9   : > { %v553_v40 = vpop.f32.mrb[0].mxu0 }
  0xea   : > { %v555_v41 = vpop.f32.mrb[1].mxu0  ;;  %v554_v42 = vadd.f32 %v553_v40, %v354_v39  ;;  %v394_v40 = vpop.permute.xlu0 %393 }
  0xeb   : > { %v556_v44 = vadd.f32 %v555_v41, %v354_v39 }
  0xec   : > { %v648_v50 = vmax.f32 %v554_v42, 0.0 }
  0xed   : > { %v559_v45 = vpop.f32.mrb[2].mxu0  ;;  %v649_v52 = vmax.f32 %v556_v44, 0.0 }
  0xee   : > { %v560_v46 = vadd.f32 %v559_v45, %v359_v43  ;;  %v561_v47 = vpop.f32.mrb[3].mxu0 }
  0xef   : > { %v562_v49 = vadd.f32 %v561_v47, %v359_v43  ;;  %v399_v43 = vpop.permute.xlu1 %398 }
  0xf0   : > { %v650_v51 = vmax.f32 %v560_v46, 0.0 }
  0xf1   : > { %v651_v53 = vmax.f32 %v562_v49, 0.0  ;;  %v565_v54 = vpop.f32.mrb[4].mxu0 }
  0xf2   : > { %v567_v55 = vpop.f32.mrb[5].mxu0  ;;  %v923_v56 = vpack.c.bf16 %v650_v51, %v648_v50  ;;  %v566_v58 = vadd.f32 %v565_v54, %v364_v48 }
  0xf3   : > { %v921_v57 = vpack.c.bf16 %v651_v53, %v649_v52  ;;  %v568_v60 = vadd.f32 %v567_v55, %v364_v48 }
  0xf4   : > { %v652_v1 = vmax.f32 %v566_v58, 0.0 }
  0xf5   : > { %v571_v61 = vpop.f32.mrb[6].mxu0  ;;  %922 = vmatprep.subr.bf16.mxu1 %v921_v57  ;;  %v653_v3 = vmax.f32 %v568_v60, 0.0 }
  0xf6   : > { %v572_v62 = vadd.f32 %v571_v61, %v369_v59  ;;  %v573_v63 = vpop.f32.mrb[7].mxu0  ;;  %924 = vmatpush1.bf16.msra.mxu1 %v923_v56  ;;  %v404_v56 = vpop.permute.xlu0 %403 }
  0xf7   : > { %v574_v0 = vadd.f32 %v573_v63, %v369_v59  ;;  %v409_v59 = vpop.permute.xlu1 %408 }
  0xf8   : > { %v654_v2 = vmax.f32 %v572_v62, 0.0 }
  0xf9   : > { %v655_v4 = vmax.f32 %v574_v0, 0.0  ;;  %v577_v5 = vpop.f32.mrb[8].mxu0 }
  0xfa   : > { %v927_v6 = vpack.c.bf16 %v654_v2, %v652_v1  ;;  %v579_v7 = vpop.f32.mrb[9].mxu0  ;;  %v578_v10 = vadd.f32 %v577_v5, %v374_v8 }
  0xfb   : > { %v925_v9 = vpack.c.bf16 %v655_v4, %v653_v3  ;;  %v580_v12 = vadd.f32 %v579_v7, %v374_v8  ;;  %v414_v8 = vpop.permute.xlu0 %413 }
  0xfc   : > { %v656_v17 = vmax.f32 %v578_v10, 0.0 }
  0xfd   : > { %v583_v13 = vpop.f32.mrb[10].mxu0  ;;  %926 = vmatprep.subr.bf16.mxu1 %v925_v9  ;;  %v657_v19 = vmax.f32 %v580_v12, 0.0 }
  0xfe   : > { %v584_v14 = vadd.f32 %v583_v13, %v379_v11  ;;  %v585_v15 = vpop.f32.mrb[11].mxu0  ;;  %928 = vmatpush1.bf16.msra.mxu1 %v927_v6 }
  0xff   : > { %v586_v16 = vadd.f32 %v585_v15, %v379_v11  ;;  %v419_v11 = vpop.permute.xlu1 %418 }
 0x100   : > { %v658_v18 = vmax.f32 %v584_v14, 0.0 }
 0x101   : > { %v659_v20 = vmax.f32 %v586_v16, 0.0  ;;  %v589_v21 = vpop.f32.mrb[12].mxu0 }
 0x102   : > { %v931_v22 = vpack.c.bf16 %v658_v18, %v656_v17  ;;  %v591_v23 = vpop.f32.mrb[13].mxu0  ;;  %v590_v26 = vadd.f32 %v589_v21, %v384_v24 }
 0x103   : > { %v929_v25 = vpack.c.bf16 %v659_v20, %v657_v19  ;;  %v592_v28 = vadd.f32 %v591_v23, %v384_v24  ;;  %v424_v24 = vpop.permute.xlu0 %423 }
 0x104   : > { %v660_v33 = vmax.f32 %v590_v26, 0.0 }
 0x105   : > { %v595_v29 = vpop.f32.mrb[14].mxu0  ;;  %930 = vmatprep.subr.bf16.mxu1 %v929_v25  ;;  %v661_v35 = vmax.f32 %v592_v28, 0.0 }
 0x106   : > { %v596_v30 = vadd.f32 %v595_v29, %v389_v27  ;;  %v597_v31 = vpop.f32.mrb[15].mxu0  ;;  %932 = vmatpush1.bf16.msra.mxu1 %v931_v22 }
 0x107   : > { %v598_v32 = vadd.f32 %v597_v31, %v389_v27  ;;  %v429_v27 = vpop.permute.xlu1 %428 }
 0x108   : > { %v662_v34 = vmax.f32 %v596_v30, 0.0 }
 0x109   : > { %v663_v36 = vmax.f32 %v598_v32, 0.0  ;;  %v601_v37 = vpop.f32.mrb[16].mxu0 }
 0x10a   : > { %v935_v38 = vpack.c.bf16 %v662_v34, %v660_v33  ;;  %v603_v39 = vpop.f32.mrb[17].mxu0  ;;  %v602_v42 = vadd.f32 %v601_v37, %v394_v40 }
 0x10b   : > { %v933_v41 = vpack.c.bf16 %v663_v36, %v661_v35  ;;  %v604_v44 = vadd.f32 %v603_v39, %v394_v40  ;;  %v680_v39 = vld [vmem:[%s1240_s3] sm:$0xf]  ;;  %v685_v40 = vpop.permute.xlu0 %684 }
 0x10c   : > { %v664_v49 = vmax.f32 %v602_v42, 0.0 }
 0x10d   : > { %v607_v45 = vpop.f32.mrb[18].mxu0  ;;  %934 = vmatprep.subr.bf16.mxu1 %v933_v41  ;;  %v665_v51 = vmax.f32 %v604_v44, 0.0 }
 0x10e   : > { %v608_v46 = vadd.f32 %v607_v45, %v399_v43  ;;  %v609_v47 = vpop.f32.mrb[19].mxu0  ;;  %936 = vmatpush1.bf16.msra.mxu1 %v935_v38 }
 0x10f   : > { %v610_v48 = vadd.f32 %v609_v47, %v399_v43 }
 0x110   : > { %v666_v50 = vmax.f32 %v608_v46, 0.0  ;;  %v764_v46 = vpop.permute.xlu1 %763 }
 0x111   : > { %v667_v52 = vmax.f32 %v610_v48, 0.0  ;;  %v613_v53 = vpop.f32.mrb[20].mxu0 }
 0x112   : > { %v939_v54 = vpack.c.bf16 %v666_v50, %v664_v49  ;;  %v615_v55 = vpop.f32.mrb[21].mxu0  ;;  %v614_v58 = vadd.f32 %v613_v53, %v404_v56  ;;  %v772_v49 = vpop.permute.xlu0 %771 }
 0x113   : > { %v937_v57 = vpack.c.bf16 %v667_v52, %v665_v51  ;;  %v616_v60 = vadd.f32 %v615_v55, %v404_v56 }
 0x114   : > { %v668_v1 = vmax.f32 %v614_v58, 0.0 }
 0x115   : > { %v619_v61 = vpop.f32.mrb[22].mxu0  ;;  %938 = vmatprep.subr.bf16.mxu1 %v937_v57  ;;  %v669_v3 = vmax.f32 %v616_v60, 0.0 }
 0x116   : > { %v620_v62 = vadd.f32 %v619_v61, %v409_v59  ;;  %v621_v63 = vpop.f32.mrb[23].mxu0  ;;  %940 = vmatpush1.bf16.msra.mxu1 %v939_v54 }
 0x117   : > { %v622_v0 = vadd.f32 %v621_v63, %v409_v59 }
 0x118   : > { %v670_v2 = vmax.f32 %v620_v62, 0.0 }
 0x119   : > { %v671_v4 = vmax.f32 %v622_v0, 0.0  ;;  %v625_v5 = vpop.f32.mrb[24].mxu0 }
 0x11a   : > { %v943_v6 = vpack.c.bf16 %v670_v2, %v668_v1  ;;  %v627_v7 = vpop.f32.mrb[25].mxu0  ;;  %v626_v10 = vadd.f32 %v625_v5, %v414_v8 }
 0x11b   : > { %v941_v9 = vpack.c.bf16 %v671_v4, %v669_v3  ;;  %v628_v12 = vadd.f32 %v627_v7, %v414_v8 }
 0x11c   : > { %v672_v17 = vmax.f32 %v626_v10, 0.0 }
 0x11d   : > { %v631_v13 = vpop.f32.mrb[26].mxu0  ;;  %942 = vmatprep.subr.bf16.mxu1 %v941_v9  ;;  %v673_v19 = vmax.f32 %v628_v12, 0.0 }
 0x11e   : > { %v632_v14 = vadd.f32 %v631_v13, %v419_v11  ;;  %v633_v15 = vpop.f32.mrb[27].mxu0  ;;  %944 = vmatpush1.bf16.msra.mxu1 %v943_v6 }
 0x11f   : > { %v634_v16 = vadd.f32 %v633_v15, %v419_v11 }
 0x120   : > { %v674_v18 = vmax.f32 %v632_v14, 0.0 }
 0x121   : > { %v675_v20 = vmax.f32 %v634_v16, 0.0  ;;  %v637_v21 = vpop.f32.mrb[28].mxu0 }
 0x122   : > { %v947_v22 = vpack.c.bf16 %v674_v18, %v672_v17  ;;  %v639_v23 = vpop.f32.mrb[29].mxu0  ;;  %v638_v26 = vadd.f32 %v637_v21, %v424_v24 }
 0x123   : > { %v945_v25 = vpack.c.bf16 %v675_v20, %v673_v19  ;;  %v640_v28 = vadd.f32 %v639_v23, %v424_v24 }
 0x124   : > { %v676_v33 = vmax.f32 %v638_v26, 0.0 }
 0x125   : > { %v643_v29 = vpop.f32.mrb[30].mxu0  ;;  %946 = vmatprep.subr.bf16.mxu1 %v945_v25  ;;  %v677_v35 = vmax.f32 %v640_v28, 0.0 }
 0x126   : > { %v644_v30 = vadd.f32 %v643_v29, %v429_v27  ;;  %v645_v31 = vpop.f32.mrb[31].mxu0  ;;  %948 = vmatpush1.bf16.msra.mxu1 %v947_v22 }
 0x127   : > { %v646_v32 = vadd.f32 %v645_v31, %v429_v27 }
 0x128   : > { %v678_v34 = vmax.f32 %v644_v30, 0.0 }
 0x129   : > { %v679_v36 = vmax.f32 %v646_v32, 0.0 }
 0x12a   : > { %v951_v37 = vpack.c.bf16 %v678_v34, %v676_v33 }
 0x12b   : > { %v949_v38 = vpack.c.bf16 %v679_v36, %v677_v35 }
 0x12d   : > { %950 = vmatprep.subr.bf16.mxu1 %v949_v38 }
 0x12e   : > { %952 = vmatpush1.bf16.msra.mxu1 %v951_v37 }
 0x131   : > { %752 = vmatmul.mubr.f32.vlgmr.msra.gmra.mrb[0].mxu1 %v680_v39 }
 0x204   : > { %v753_v41 = vpop.f32.mrb[0].mxu1 }
 0x205   : > { %v754_v42 = vadd.f32 %v753_v41, %v685_v40  ;;  %v755_v43 = vpop.f32.mrb[1].mxu1 }
 0x206   : > { %v756_v44 = vadd.f32 %v755_v43, %v685_v40 }
 0x207   : > { %v758_v45 = vmax.f32 %v754_v42, 0.0 }
 0x208   : > { %v759_v47 = vmax.f32 %v756_v44, 0.0 }
 0x209   : > { %v766_v48 = vmul.f32 %v764_v46, %v758_v45 }
 0x20a   : > { %v767_v50 = vmul.f32 %v764_v46, %v759_v47 }
 0x20b   : > { %v774_v51 = vadd.f32 %v772_v49, %v766_v48 }
 0x20c   : > { %v775_v52 = vadd.f32 %v772_v49, %v767_v50 }
 0x20d   : > { %v776_v53 = vmul.f32 %v774_v51, %v774_v51 }
 0x20e   : > { %v777_v54 = vmul.f32 %v775_v52, %v775_v52 }
 0x20f   : > { %v778_v55 = vsel %vm482_vm0, %v776_v53, 0.0 }
 0x210   : > { %v779_v56 = vrot.slane %v778_v55, 4  ;;  %v785_v57 = vsel %vm482_vm0, %v777_v54, 0.0 }
 0x211   : > { %v786_v58 = vrot.slane %v785_v57, 4 }
 0x212   : > { %v780_v59 = vadd.f32 %v779_v56, %v778_v55 }
 0x213   : > { %v787_v60 = vadd.f32 %v786_v58, %v785_v57 }
 0x214   : > { %v781_v61 = vrot.slane %v780_v59, 2 }
 0x215   : > { %v788_v62 = vrot.slane %v787_v60, 2 }
 0x216   : > { %v782_v63 = vadd.f32 %v781_v61, %v780_v59 }
 0x217   : > { %v789_v0 = vadd.f32 %v788_v62, %v787_v60 }
 0x218   : > { %v783_v1 = vrot.slane %v782_v63, 1 }
 0x219   : > { %v790_v2 = vrot.slane %v789_v0, 1 }
 0x21a   : > { %v784_v3 = vadd.f32 %v783_v1, %v782_v63 }
 0x21b   : > { %v791_v4 = vadd.f32 %v790_v2, %v789_v0 }
 0x21c   : > { %v792_v5 = vmax.f32 %v784_v3, 1e-24 }
 0x21d   : > { %v793_v6 = vmax.f32 %v791_v4, 1e-24 }
 0x21e   : > { %982 = vrsqrt.f32 %v792_v5 }
 0x21f   : > { %984 = vrsqrt.f32 %v793_v6 }
 0x228   : > { %v983_v7 = vpop.eup %982 }
 0x229   : > { %v985_v8 = vpop.eup %984  ;;  %v796_v9 = vmul.f32 %v983_v7, %v774_v51 }
 0x22a   : > { %v797_v10 = vmul.f32 %v985_v8, %v775_v52 }
 0x22c   : > { %v800_v11 = vcombine.low %v796_v9, %v797_v10 }
 0x22e   : > { %802 = vst [vmem:[%s316_s11] sm:$0xff] %v800_v11 }
 0x22f PF: > { %s17_s26 = sadd.s32 1, %s1008_s26   ;;  %s1245_s24 = smov %s1004_s25 }
 0x230   : > { %p14_p5 = scmp.ge.s32.totalorder %s17_s26, 4   ;;  %s1246_s25 = smov %s1248_s27 }
 0x232   :  { %16 = sbr.rel (!%p14_p5) target bundleno = 2 (0x2), region = 78 }

// kernel: predictor_forward.4
= control target key start
LH: loop header
LB: loop body
LE: loop exit
PB: predicated region body
PF: predicated region fallthrough
CT: control target
= control target key end

     0   :  { %s1032_s21 = smov 0   ;;  %s1034_s22 = smov 0   ;;  %s1213_s0 = inlined_call_operand.vmem [shape: f32[2,4,256], index: 0, kind: input, shape index: {}]   ;;  %s1214_s1 = inlined_call_operand.vmem [shape: f32[128,4], index: 1, kind: input, shape index: {}]   ;;  %s1215_s2 = inlined_call_operand.vmem [shape: f32[128,1], index: 2, kind: input, shape index: {}]   ;;  %s1216_s3 = inlined_call_operand.vmem [shape: f32[4,128], index: 3, kind: input, shape index: {}]   ;;  %s1217_s4 = inlined_call_operand.vmem [shape: f32[4,1], index: 4, kind: input, shape index: {}]   ;;  %s1218_s5 = inlined_call_operand.vmem [shape: f32[2,1,4,1], index: 5, kind: output, shape index: {0}]   ;;  %s1219_s6 = inlined_call_operand.vmem [shape: f32[2,1,4,1], index: 6, kind: output, shape index: {1}]  }
   0x1   :  { %s1036_s23 = smov 0  }
   0x2 LB: > { %s29_s24 = sadd.s32 1, %s989_s22  ;;  %p884_p0 = scmp.ge.s32.totalorder %s993_s23, 1  ;;  %s993_s23 = sphi %s1036_s23, %s17_s23   ;;  %s989_s22 = sphi %s1034_s22, %s1221_s22   ;;  %s985_s21 = sphi %s1032_s21, %s1220_s21  }
   0x3   : > { %p31_p1 = scmp.ge.s32.totalorder %s29_s24, 2  ;;  %p238_p2 = scmp.lt.s32.totalorder %s993_s23, 3 }
   0x5   : > { %s1223_s24 = smov (%p31_p1, %s29_s24), 0  ;;  %p239_p3 = pnand %p884_p0, %p238_p2 }
   0x6   : > { %p282_p4 = scmp.lt.s32.totalorder (!%p239_p3), %s985_s21, 1  ;;  %v995_v0 = vmov (!%p239_p3), 0.0   ;;  %v996_v1 = vmov (!%p239_p3), 0   ;;  %v322_v2 = vld [vmem:[%s1215_s2] sm:$0xff] (!%p239_p3)  ;;  %vm469_vm0 = vcmask (!%p239_p3), 1043456   ;;  %v324_v4 = vld [vmem:[%s1215_s2 + $0x10] sm:$0xff] (!%p239_p3) }
   0x7   : > { %242 = sbr.rel (%p239_p3) target bundleno = 670 (0x29e), region = 40  ;;  %538 = vmatprep.mubr.f32.mxu0 (!%p239_p3), %v995_v0  ;;  %738 = vmatprep.mubr.f32.mxu1 (!%p239_p3), %v995_v0  ;;  %v323_v6 = vld [vmem:[%s1215_s2 + $0x8] sm:$0xff] (!%p239_p3)  ;;  %v305_v7 = vld [vmem:[%s1214_s1] sm:$0xff] (!%p239_p3)  ;;  %vm420_vm1 = vcmask (!%p239_p3), 31744   ;;  %v325_v8 = vld [vmem:[%s1215_s2 + $0x18] sm:$0xff] (!%p239_p3)  ;;  %vm752_vm2 = vcmask (!%p239_p3), 3072  }
   0x8   : > { %968 = vset.pattern.permute.xlu0 (!%p239_p3), %v996_v1  ;;  %969 = vset.pattern.permute.xlu1 (!%p239_p3), %v996_v1  ;;  %v326_v9 = vld [vmem:[%s1215_s2 + $0x20] sm:$0xff] (!%p239_p3)  ;;  %v306_v10 = vld [vmem:[%s1214_s1 + $0x8] sm:$0xff] (!%p239_p3)  ;;  %v328_v12 = vld [vmem:[%s1215_s2 + $0x30] sm:$0xff] (!%p239_p3) }
   0x9   : > { %340 = vperm.xlu0 (!%p239_p3), %968, %v322_v2   ;;  %350 = vperm.xlu1 (!%p239_p3), %969, %v324_v4   ;;  %v327_v11 = vld [vmem:[%s1215_s2 + $0x28] sm:$0xff] (!%p239_p3)  ;;  %v307_v13 = vld [vmem:[%s1214_s1 + $0x10] sm:$0xff] (!%p239_p3)  ;;  %v329_v14 = vld [vmem:[%s1215_s2 + $0x38] sm:$0xff] (!%p239_p3) }
   0xa   : > { %v330_v15 = vld [vmem:[%s1215_s2 + $0x40] sm:$0xff] (!%p239_p3)  ;;  %v308_v16 = vld [vmem:[%s1214_s1 + $0x18] sm:$0xff] (!%p239_p3)  ;;  %v331_v17 = vld [vmem:[%s1215_s2 + $0x48] sm:$0xff] (!%p239_p3) }
   0xb   : > { %v332_v18 = vld [vmem:[%s1215_s2 + $0x50] sm:$0xff] (!%p239_p3)  ;;  %v309_v19 = vld [vmem:[%s1214_s1 + $0x20] sm:$0xff] (!%p239_p3)  ;;  %v333_v20 = vld [vmem:[%s1215_s2 + $0x58] sm:$0xff] (!%p239_p3) }
   0xc   : > { %v334_v21 = vld [vmem:[%s1215_s2 + $0x60] sm:$0xff] (!%p239_p3)  ;;  %v310_v22 = vld [vmem:[%s1214_s1 + $0x28] sm:$0xff] (!%p239_p3)  ;;  %v336_v24 = vld [vmem:[%s1215_s2 + $0x70] sm:$0xff] (!%p239_p3) }
   0xd   : > { %345 = vperm.xlu0 (!%p239_p3), %968, %v323_v6   ;;  %355 = vperm.xlu1 (!%p239_p3), %969, %v325_v8   ;;  %v335_v23 = vld [vmem:[%s1215_s2 + $0x68] sm:$0xff] (!%p239_p3)  ;;  %v311_v25 = vld [vmem:[%s1214_s1 + $0x30] sm:$0xff] (!%p239_p3)  ;;  %v337_v26 = vld [vmem:[%s1215_s2 + $0x78] sm:$0xff] (!%p239_p3) }
   0xe   : > { %s1225_s21 = smov (!%p282_p4, %s985_s21), 1  ;;  %v668_v27 = vld [vmem:[%s1217_s4] sm:$0xf]  ;;  %v312_v28 = vld [vmem:[%s1214_s1 + $0x38] sm:$0xff]  ;;  %v314_v30 = vld [vmem:[%s1214_s1 + $0x48] sm:$0xff] }
   0xf   : > { %s909_s25 = sshll.u32 %s1225_s21, 3  ;;  %v313_v29 = vld [vmem:[%s1214_s1 + $0x40] sm:$0xff]  ;;  %v315_v31 = vld [vmem:[%s1214_s1 + $0x50] sm:$0xff]  ;;  %v316_v32 = vld [vmem:[%s1214_s1 + $0x58] sm:$0xff]  ;;  %s887_s13 = sshll.u32 %s1225_s21, 2 }
  0x10   : > { %s289_s28 = scalar_lea.vmem %s1213_s0, %s909_s25  ;;  %v317_v33 = vld [vmem:[%s1214_s1 + $0x60] sm:$0xff]  ;;  %v318_v34 = vld [vmem:[%s1214_s1 + $0x68] sm:$0xff]  ;;  %v319_v35 = vld [vmem:[%s1214_s1 + $0x70] sm:$0xff]  ;;  %s297_s16 = scalar_lea.vmem %s1218_s5, %s887_s13 }
  0x11   : > { %v321_v3 = vld [vmem:[%s289_s28] sm:$0xff]  ;;  %360 = vperm.xlu0 %968, %v326_v9   ;;  %365 = vperm.xlu1 %969, %v327_v11   ;;  %v320_v36 = vld [vmem:[%s1214_s1 + $0x78] sm:$0xff]  ;;  %s304_s19 = scalar_lea.vmem %s1219_s6, %s887_s13 }
  0x12   : > { %v419_v5 = vcombine.high %v321_v3, %v321_v3 }
  0x14   : > { %889 = vmatprep.subr.msk.mxu0 %vm469_vm0, %v419_v5 }
  0x15   : > { %890 = vmatpush1.msk.msra.mxu0 %vm469_vm0, %v321_v3  ;;  %370 = vperm.xlu0 %968, %v328_v12  }
  0x16   : > { %891 = vmatmul.mubr.msk.f32.vlgmr.msra.gmra.mrb[0].mxu0 %vm420_vm1, %v305_v7  ;;  %375 = vperm.xlu1 %969, %v329_v14  }
  0x17   : > { %544 = vmatprep.mubr.f32.mxu0 %v995_v0 }
  0x19   : > { %380 = vperm.xlu0 %968, %v330_v15  }
  0x1a   : > { %892 = vmatmul.mubr.msk.f32.gmra.mrb[2].mxu0 %vm420_vm1, %v306_v10  ;;  %385 = vperm.xlu1 %969, %v331_v17  }
  0x1b   : > { %550 = vmatprep.mubr.f32.mxu0 %v995_v0 }
  0x1d   : > { %390 = vperm.xlu0 %968, %v332_v18  }
  0x1e   : > { %893 = vmatmul.mubr.msk.f32.gmra.mrb[4].mxu0 %vm420_vm1, %v307_v13  ;;  %395 = vperm.xlu1 %969, %v333_v20  }
  0x1f   : > { %556 = vmatprep.mubr.f32.mxu0 %v995_v0 }
  0x21   : > { %400 = vperm.xlu0 %968, %v334_v21  }
  0x22   : > { %894 = vmatmul.mubr.msk.f32.gmra.mrb[6].mxu0 %vm420_vm1, %v308_v16  ;;  %405 = vperm.xlu1 %969, %v335_v23  }
  0x23   : > { %562 = vmatprep.mubr.f32.mxu0 %v995_v0 }
  0x25   : > { %410 = vperm.xlu0 %968, %v336_v24  }
  0x26   : > { %895 = vmatmul.mubr.msk.f32.gmra.mrb[8].mxu0 %vm420_vm1, %v309_v19  ;;  %415 = vperm.xlu1 %969, %v337_v26  }
  0x27   : > { %568 = vmatprep.mubr.f32.mxu0 %v995_v0 }
  0x29   : > { %671 = vperm.xlu0 %968, %v668_v27  }
  0x2a   : > { %896 = vmatmul.mubr.msk.f32.gmra.mrb[10].mxu0 %vm420_vm1, %v310_v22 }
  0x2b   : > { %574 = vmatprep.mubr.f32.mxu0 %v995_v0 }
  0x2e   : > { %897 = vmatmul.mubr.msk.f32.gmra.mrb[12].mxu0 %vm420_vm1, %v311_v25 }
  0x2f   : > { %580 = vmatprep.mubr.f32.mxu0 %v995_v0 }
  0x32   : > { %898 = vmatmul.mubr.msk.f32.gmra.mrb[14].mxu0 %vm420_vm1, %v312_v28 }
  0x33   : > { %586 = vmatprep.mubr.f32.mxu0 %v995_v0 }
  0x36   : > { %899 = vmatmul.mubr.msk.f32.gmra.mrb[16].mxu0 %vm420_vm1, %v313_v29 }
  0x37   : > { %592 = vmatprep.mubr.f32.mxu0 %v995_v0 }
  0x3a   : > { %900 = vmatmul.mubr.msk.f32.gmra.mrb[18].mxu0 %vm420_vm1, %v314_v30 }
  0x3b   : > { %598 = vmatprep.mubr.f32.mxu0 %v995_v0 }
  0x3e   : > { %901 = vmatmul.mubr.msk.f32.gmra.mrb[20].mxu0 %vm420_vm1, %v315_v31 }
  0x3f   : > { %604 = vmatprep.mubr.f32.mxu0 %v995_v0 }
  0x42   : > { %902 = vmatmul.mubr.msk.f32.gmra.mrb[22].mxu0 %vm420_vm1, %v316_v32 }
  0x43   : > { %610 = vmatprep.mubr.f32.mxu0 %v995_v0 }
  0x46   : > { %903 = vmatmul.mubr.msk.f32.gmra.mrb[24].mxu0 %vm420_vm1, %v317_v33 }
  0x47   : > { %616 = vmatprep.mubr.f32.mxu0 %v995_v0 }
  0x4a   : > { %904 = vmatmul.mubr.msk.f32.gmra.mrb[26].mxu0 %vm420_vm1, %v318_v34 }
  0x4b   : > { %622 = vmatprep.mubr.f32.mxu0 %v995_v0 }
  0x4e   : > { %905 = vmatmul.mubr.msk.f32.gmra.mrb[28].mxu0 %vm420_vm1, %v319_v35 }
  0x4f   : > { %628 = vmatprep.mubr.f32.mxu0 %v995_v0 }
  0x52   : > { %906 = vmatmul.mubr.msk.f32.gmra.mrb[30].mxu0 %vm420_vm1, %v320_v36 }
  0x88   : > { %v341_v37 = vpop.permute.xlu0 %340  ;;  %v351_v46 = vpop.permute.xlu1 %350 }
  0x8c   : > { %v346_v41 = vpop.permute.xlu0 %345  ;;  %v356_v57 = vpop.permute.xlu1 %355 }
  0x90   : > { %v361_v6 = vpop.permute.xlu0 %360  ;;  %v366_v9 = vpop.permute.xlu1 %365 }
  0x94   : > { %v371_v22 = vpop.permute.xlu0 %370 }
  0x95   : > { %v376_v25 = vpop.permute.xlu1 %375 }
  0xe9   : > { %v540_v38 = vpop.f32.mrb[0].mxu0 }
  0xea   : > { %v542_v39 = vpop.f32.mrb[1].mxu0  ;;  %v541_v40 = vadd.f32 %v540_v38, %v341_v37  ;;  %v381_v38 = vpop.permute.xlu0 %380 }
  0xeb   : > { %v543_v42 = vadd.f32 %v542_v39, %v341_v37 }
  0xec   : > { %v635_v48 = vmax.f32 %v541_v40, 0.0 }
  0xed   : > { %v546_v43 = vpop.f32.mrb[2].mxu0  ;;  %v636_v50 = vmax.f32 %v543_v42, 0.0 }
  0xee   : > { %v547_v44 = vadd.f32 %v546_v43, %v346_v41  ;;  %v548_v45 = vpop.f32.mrb[3].mxu0 }
  0xef   : > { %v549_v47 = vadd.f32 %v548_v45, %v346_v41  ;;  %v386_v41 = vpop.permute.xlu1 %385 }
  0xf0   : > { %v637_v49 = vmax.f32 %v547_v44, 0.0 }
  0xf1   : > { %v638_v51 = vmax.f32 %v549_v47, 0.0  ;;  %v552_v52 = vpop.f32.mrb[4].mxu0 }
  0xf2   : > { %v554_v53 = vpop.f32.mrb[5].mxu0  ;;  %v912_v54 = vpack.c.bf16 %v637_v49, %v635_v48  ;;  %v553_v56 = vadd.f32 %v552_v52, %v351_v46 }
  0xf3   : > { %v910_v55 = vpack.c.bf16 %v638_v51, %v636_v50  ;;  %v555_v58 = vadd.f32 %v554_v53, %v351_v46 }
  0xf4   : > { %v639_v63 = vmax.f32 %v553_v56, 0.0 }
  0xf5   : > { %v558_v59 = vpop.f32.mrb[6].mxu0  ;;  %911 = vmatprep.subr.bf16.mxu1 %v910_v55  ;;  %v640_v1 = vmax.f32 %v555_v58, 0.0 }
  0xf6   : > { %v559_v60 = vadd.f32 %v558_v59, %v356_v57  ;;  %v560_v61 = vpop.f32.mrb[7].mxu0  ;;  %913 = vmatpush1.bf16.msra.mxu1 %v912_v54  ;;  %v391_v54 = vpop.permute.xlu0 %390 }
  0xf7   : > { %v561_v62 = vadd.f32 %v560_v61, %v356_v57  ;;  %v396_v57 = vpop.permute.xlu1 %395 }
  0xf8   : > { %v641_v0 = vmax.f32 %v559_v60, 0.0 }
  0xf9   : > { %v642_v2 = vmax.f32 %v561_v62, 0.0  ;;  %v564_v3 = vpop.f32.mrb[8].mxu0 }
  0xfa   : > { %v916_v4 = vpack.c.bf16 %v641_v0, %v639_v63  ;;  %v566_v5 = vpop.f32.mrb[9].mxu0  ;;  %v565_v8 = vadd.f32 %v564_v3, %v361_v6 }
  0xfb   : > { %v914_v7 = vpack.c.bf16 %v642_v2, %v640_v1  ;;  %v567_v10 = vadd.f32 %v566_v5, %v361_v6  ;;  %v401_v6 = vpop.permute.xlu0 %400 }
  0xfc   : > { %v643_v15 = vmax.f32 %v565_v8, 0.0 }
  0xfd   : > { %v570_v11 = vpop.f32.mrb[10].mxu0  ;;  %915 = vmatprep.subr.bf16.mxu1 %v914_v7  ;;  %v644_v17 = vmax.f32 %v567_v10, 0.0 }
  0xfe   : > { %v571_v12 = vadd.f32 %v570_v11, %v366_v9  ;;  %v572_v13 = vpop.f32.mrb[11].mxu0  ;;  %917 = vmatpush1.bf16.msra.mxu1 %v916_v4 }
  0xff   : > { %v573_v14 = vadd.f32 %v572_v13, %v366_v9  ;;  %v406_v9 = vpop.permute.xlu1 %405 }
 0x100   : > { %v645_v16 = vmax.f32 %v571_v12, 0.0 }
 0x101   : > { %v646_v18 = vmax.f32 %v573_v14, 0.0  ;;  %v576_v19 = vpop.f32.mrb[12].mxu0 }
 0x102   : > { %v920_v20 = vpack.c.bf16 %v645_v16, %v643_v15  ;;  %v578_v21 = vpop.f32.mrb[13].mxu0  ;;  %v577_v24 = vadd.f32 %v576_v19, %v371_v22 }
 0x103   : > { %v918_v23 = vpack.c.bf16 %v646_v18, %v644_v17  ;;  %v579_v26 = vadd.f32 %v578_v21, %v371_v22  ;;  %v411_v22 = vpop.permute.xlu0 %410 }
 0x104   : > { %v647_v31 = vmax.f32 %v577_v24, 0.0 }
 0x105   : > { %v582_v27 = vpop.f32.mrb[14].mxu0  ;;  %919 = vmatprep.subr.bf16.mxu1 %v918_v23  ;;  %v648_v33 = vmax.f32 %v579_v26, 0.0 }
 0x106   : > { %v583_v28 = vadd.f32 %v582_v27, %v376_v25  ;;  %v584_v29 = vpop.f32.mrb[15].mxu0  ;;  %921 = vmatpush1.bf16.msra.mxu1 %v920_v20 }
 0x107   : > { %v585_v30 = vadd.f32 %v584_v29, %v376_v25  ;;  %v416_v25 = vpop.permute.xlu1 %415 }
 0x108   : > { %v649_v32 = vmax.f32 %v583_v28, 0.0 }
 0x109   : > { %v650_v34 = vmax.f32 %v585_v30, 0.0  ;;  %v588_v35 = vpop.f32.mrb[16].mxu0 }
 0x10a   : > { %v924_v36 = vpack.c.bf16 %v649_v32, %v647_v31  ;;  %v590_v37 = vpop.f32.mrb[17].mxu0  ;;  %v589_v40 = vadd.f32 %v588_v35, %v381_v38 }
 0x10b   : > { %v922_v39 = vpack.c.bf16 %v650_v34, %v648_v33  ;;  %v591_v42 = vadd.f32 %v590_v37, %v381_v38  ;;  %v667_v37 = vld [vmem:[%s1216_s3] sm:$0xf]  ;;  %v672_v38 = vpop.permute.xlu0 %671 }
 0x10c   : > { %v651_v47 = vmax.f32 %v589_v40, 0.0 }
 0x10d   : > { %v594_v43 = vpop.f32.mrb[18].mxu0  ;;  %923 = vmatprep.subr.bf16.mxu1 %v922_v39  ;;  %v652_v49 = vmax.f32 %v591_v42, 0.0 }
 0x10e   : > { %v595_v44 = vadd.f32 %v594_v43, %v386_v41  ;;  %v596_v45 = vpop.f32.mrb[19].mxu0  ;;  %925 = vmatpush1.bf16.msra.mxu1 %v924_v36 }
 0x10f   : > { %v597_v46 = vadd.f32 %v596_v45, %v386_v41 }
 0x110   : > { %v653_v48 = vmax.f32 %v595_v44, 0.0 }
 0x111   : > { %v654_v50 = vmax.f32 %v597_v46, 0.0  ;;  %v600_v51 = vpop.f32.mrb[20].mxu0 }
 0x112   : > { %v928_v52 = vpack.c.bf16 %v653_v48, %v651_v47  ;;  %v602_v53 = vpop.f32.mrb[21].mxu0  ;;  %v601_v56 = vadd.f32 %v600_v51, %v391_v54 }
 0x113   : > { %v926_v55 = vpack.c.bf16 %v654_v50, %v652_v49  ;;  %v603_v58 = vadd.f32 %v602_v53, %v391_v54 }
 0x114   : > { %v655_v63 = vmax.f32 %v601_v56, 0.0 }
 0x115   : > { %v606_v59 = vpop.f32.mrb[22].mxu0  ;;  %927 = vmatprep.subr.bf16.mxu1 %v926_v55  ;;  %v656_v1 = vmax.f32 %v603_v58, 0.0 }
 0x116   : > { %v607_v60 = vadd.f32 %v606_v59, %v396_v57  ;;  %v608_v61 = vpop.f32.mrb[23].mxu0  ;;  %929 = vmatpush1.bf16.msra.mxu1 %v928_v52 }
 0x117   : > { %v609_v62 = vadd.f32 %v608_v61, %v396_v57 }
 0x118   : > { %v657_v0 = vmax.f32 %v607_v60, 0.0 }
 0x119   : > { %v658_v2 = vmax.f32 %v609_v62, 0.0  ;;  %v612_v3 = vpop.f32.mrb[24].mxu0 }
 0x11a   : > { %v932_v4 = vpack.c.bf16 %v657_v0, %v655_v63  ;;  %v614_v5 = vpop.f32.mrb[25].mxu0  ;;  %v613_v8 = vadd.f32 %v612_v3, %v401_v6 }
 0x11b   : > { %v930_v7 = vpack.c.bf16 %v658_v2, %v656_v1  ;;  %v615_v10 = vadd.f32 %v614_v5, %v401_v6 }
 0x11c   : > { %v659_v15 = vmax.f32 %v613_v8, 0.0 }
 0x11d   : > { %v618_v11 = vpop.f32.mrb[26].mxu0  ;;  %931 = vmatprep.subr.bf16.mxu1 %v930_v7  ;;  %v660_v17 = vmax.f32 %v615_v10, 0.0 }
 0x11e   : > { %v619_v12 = vadd.f32 %v618_v11, %v406_v9  ;;  %v620_v13 = vpop.f32.mrb[27].mxu0  ;;  %933 = vmatpush1.bf16.msra.mxu1 %v932_v4 }
 0x11f   : > { %v621_v14 = vadd.f32 %v620_v13, %v406_v9 }
 0x120   : > { %v661_v16 = vmax.f32 %v619_v12, 0.0 }
 0x121   : > { %v662_v18 = vmax.f32 %v621_v14, 0.0  ;;  %v624_v19 = vpop.f32.mrb[28].mxu0 }
 0x122   : > { %v936_v20 = vpack.c.bf16 %v661_v16, %v659_v15  ;;  %v626_v21 = vpop.f32.mrb[29].mxu0  ;;  %v625_v24 = vadd.f32 %v624_v19, %v411_v22 }
 0x123   : > { %v934_v23 = vpack.c.bf16 %v662_v18, %v660_v17  ;;  %v627_v26 = vadd.f32 %v626_v21, %v411_v22 }
 0x124   : > { %v663_v31 = vmax.f32 %v625_v24, 0.0 }
 0x125   : > { %v630_v27 = vpop.f32.mrb[30].mxu0  ;;  %935 = vmatprep.subr.bf16.mxu1 %v934_v23  ;;  %v664_v33 = vmax.f32 %v627_v26, 0.0 }
 0x126   : > { %v631_v28 = vadd.f32 %v630_v27, %v416_v25  ;;  %v632_v29 = vpop.f32.mrb[31].mxu0  ;;  %937 = vmatpush1.bf16.msra.mxu1 %v936_v20 }
 0x127   : > { %v633_v30 = vadd.f32 %v632_v29, %v416_v25 }
 0x128   : > { %v665_v32 = vmax.f32 %v631_v28, 0.0 }
 0x129   : > { %v666_v34 = vmax.f32 %v633_v30, 0.0 }
 0x12a   : > { %v940_v35 = vpack.c.bf16 %v665_v32, %v663_v31 }
 0x12b   : > { %v938_v36 = vpack.c.bf16 %v666_v34, %v664_v33 }
 0x12d   : > { %939 = vmatprep.subr.bf16.mxu1 %v938_v36 }
 0x12e   : > { %941 = vmatpush1.bf16.msra.mxu1 %v940_v35 }
 0x131   : > { %739 = vmatmul.mubr.f32.vlgmr.msra.gmra.mrb[0].mxu1 %v667_v37 }
 0x204   : > { %v740_v39 = vpop.f32.mrb[0].mxu1 }
 0x205   : > { %v741_v40 = vadd.f32 %v740_v39, %v672_v38  ;;  %v742_v41 = vpop.f32.mrb[1].mxu1 }
 0x206   : > { %v743_v42 = vadd.f32 %v742_v41, %v672_v38 }
 0x207   : > { %v745_v43 = vmax.f32 %v741_v40, 0.0 }
 0x208   : > { %v746_v44 = vmax.f32 %v743_v42, 0.0 }
 0x209   : > { %v754_v45 = vmul.f32 %v745_v43, %v745_v43  ;;  %v747_v46 = vsel %vm469_vm0, %v745_v43, 0.0 }
 0x20a   : > { %v755_v47 = vmul.f32 %v746_v44, %v746_v44  ;;  %v748_v48 = vsel %vm469_vm0, %v746_v44, 0.0 }
 0x20b   : > { %v749_v49 = vadd.f32 %v748_v48, %v747_v46  ;;  %v756_v50 = vsel %vm469_vm0, %v754_v45, 0.0 }
 0x20c   : > { %v757_v51 = vsel %vm469_vm0, %v755_v47, 0.0 }
 0x20d   : > { %750 = vadd.xlane.f32.xlu1 %v749_v49  ;;  %v758_v52 = vadd.f32 %v757_v51, %v756_v50 }
 0x20f   : > { %759 = vadd.xlane.f32.xlu0 %v758_v52 }
 0x29a   : > { %v751_v53 = vpop.xlane.xlu1 %750 }
 0x29b   : > { %753 = vst.msk [vmem:[%s297_s16] sm:$0xf] %vm752_vm2, %v751_v53 }
 0x29c   : > { %v760_v54 = vpop.xlane.xlu0 %759 }
 0x29d   : > { %761 = vst.msk [vmem:[%s304_s19] sm:$0xf] %vm752_vm2, %v760_v54 }
 0x29e PF: > { %s17_s23 = sadd.s32 1, %s993_s23   ;;  %s1220_s21 = smov %s989_s22 }
 0x29f   : > { %p14_p5 = scmp.ge.s32.totalorder %s17_s23, 4   ;;  %s1221_s22 = smov %s1223_s24 }
 0x2a1   :  { %16 = sbr.rel (!%p14_p5) target bundleno = 2 (0x2), region = 82 }

</bundles_post_ra>
